<compile_context>
chip_gen: v6e
topology: v6e:2x2x1
jax: 0.10.0
libtpu: 0.0.40
codegen_flags: <defaults>
</compile_context>

<pallas_src>
import numpy as np

import jax
import jax.numpy as jnp
from jax.experimental import pallas as pl
from jax.experimental.pallas import tpu as pltpu

# ----------------------------------------------------------------------------
# Sizes (logical / padded)
# ----------------------------------------------------------------------------
C1 = 32              # conv1 out channels
C2 = 469             # conv2 out channels (= BiLSTM input size)
C2P = 512            # conv2 out channels, lane padded
C2K = 480            # contraction pad for the LSTM gates matmul (multiple of 16)
HID = 200            # LSTM hidden size
GW = 6 * HID         # packed gate width: [i_f | i_b | g_f | g_b | o_f | o_b]
K1B = 81             # conv1-patch elems per conv2 position: 9 taps * 3*3
K1BP = 128           # ... lane padded
K2 = 9 * C1          # fused conv2 contraction: 9 taps * 32 channels = 288
K2P = 384            # ... lane padded
NEG = -1.0e9         # conv1 bias for out-of-range conv2 taps -> ReLU -> exact 0


# ----------------------------------------------------------------------------
# Static gather tables: conv2 output position (16) x tap (9) x conv1 patch (9)
# -> coordinates into the (18, 18) zero-padded input frame.
# ----------------------------------------------------------------------------
def _build_gather_tables():
    rows = np.zeros((16, K1B), np.int32)
    cols = np.zeros((16, K1B), np.int32)
    valid = np.zeros((16, K1B), np.float32)
    for ho in range(4):
        for wo in range(4):
            p = ho * 4 + wo
            for kh2 in range(3):
                for kw2 in range(3):
                    t = kh2 * 3 + kw2
                    hi, wi = 2 * ho + kh2 - 1, 2 * wo + kw2 - 1
                    if 0 <= hi < 8 and 0 <= wi < 8:          # conv2 pad=1 validity
                        for kh1 in range(3):
                            for kw1 in range(3):
                                k = t * 9 + kh1 * 3 + kw1
                                rows[p, k] = 2 * hi + kh1    # conv1 stride 2, pad 1
                                cols[p, k] = 2 * wi + kw1
                                valid[p, k] = 1.0
    return rows, cols, valid


_ROWS, _COLS, _VALID = _build_gather_tables()


# ----------------------------------------------------------------------------
# Fused kernel (one grid step == one batch element):
#   conv1 (block-diag matmul) -> conv2 (one fused matmul) -> GAP (f32 mean)
#   -> BiLSTM gates matmul + nonlinearities -> (1, 400) output row.
# ----------------------------------------------------------------------------
def _fused_kernel(g_ref, w1_ref, b1_ref, w2_ref, b2_ref, wl_ref, bl_ref, o_ref):
    f32, bf16 = jnp.float32, jnp.bfloat16
    g = g_ref[0]                                                   # (16, K1BP) bf16

    # conv1, evaluated per (conv2 position, tap) via one block-diagonal matmul.
    # Out-of-range taps carry bias NEG -> ReLU -> exact 0 (implements conv2 pad=1).
    y = jnp.dot(g, w1_ref[...], preferred_element_type=f32)       # (16, K2P)
    y = jnp.maximum(y + b1_ref[...], 0.0).astype(bf16)

    # conv2 as ONE fused matmul over K = 9 taps * 32 channels, + bias, ReLU (f32).
    feat = jnp.dot(y, w2_ref[...], preferred_element_type=f32)    # (16, C2P)
    feat = jnp.maximum(feat + b2_ref[...], 0.0)

    # Global average pool over the 16 spatial positions, kept in f32.
    gap = jnp.mean(feat, axis=0, keepdims=True)                   # (1, C2P)

    # BiLSTM, single timestep, zero initial state: W_hh and the forget gate are dead.
    gates = jnp.dot(gap[:, :C2K].astype(bf16), wl_ref[...],
                    preferred_element_type=f32) + bl_ref[...]     # (1, GW)
    i_g = jax.nn.sigmoid(gates[:, 0:2 * HID])                     # [i_f | i_b]
    g_g = jnp.tanh(gates[:, 2 * HID:4 * HID])                     # [g_f | g_b]
    o_g = jax.nn.sigmoid(gates[:, 4 * HID:6 * HID])               # [o_f | o_b]
    h = o_g * jnp.tanh(i_g * g_g)                                 # c = i*g since c0 == 0
    o_ref[0] = h.astype(o_ref.dtype)                              # (1, 400) = [h_f | h_b]


# ----------------------------------------------------------------------------
# Parameter packing (numpy, one-time) and wrapper.
# ----------------------------------------------------------------------------
def _pack_params(conv1_w, conv1_b, conv2_w, conv2_b, w_ih_f, w_ih_b, b_f, b_b):
    conv1_w, conv1_b, conv2_w, conv2_b, w_ih_f, w_ih_b, b_f, b_b = map(
        np.asarray, (conv1_w, conv1_b, conv2_w, conv2_b, w_ih_f, w_ih_b, b_f, b_b))

    # conv1 block-diagonal weight: rows = (tap, patch elem), cols = (tap, cout).
    w1b = np.zeros((K1BP, K2P), np.float32)
    w1_flat = conv1_w.reshape(C1, 9).T                            # (9, 32), k = kh1*3+kw1
    for t in range(9):
        w1b[t * 9:(t + 1) * 9, t * C1:(t + 1) * C1] = w1_flat

    # Per-(position, tap) conv1 bias; NEG on out-of-range taps (conv2 pad=1).
    b1b = np.zeros((16, K2P), np.float32)
    for ho in range(4):
        for wo in range(4):
            p = ho * 4 + wo
            for kh2 in range(3):
                for kw2 in range(3):
                    t = kh2 * 3 + kw2
                    hi, wi = 2 * ho + kh2 - 1, 2 * wo + kw2 - 1
                    ok = (0 <= hi < 8) and (0 <= wi < 8)
                    b1b[p, t * C1:(t + 1) * C1] = conv1_b if ok else NEG

    # Fused conv2 weight: rows = (tap, cin), cols = cout.
    w2f = np.zeros((K2P, C2P), np.float32)
    for kh2 in range(3):
        for kw2 in range(3):
            t = kh2 * 3 + kw2
            w2f[t * C1:(t + 1) * C1, :C2] = conv2_w[:, :, kh2, kw2].T
    b2p = np.zeros((1, C2P), np.float32)
    b2p[0, :C2] = conv2_b

    # BiLSTM input weights/biases.  PyTorch gate order (i, f, g, o); forget gate and
    # W_hh dropped (h0 = c0 = 0, single timestep).  Packed column layout:
    # [i_f | i_b | g_f | g_b | o_f | o_b], each HID wide -> h = [h_f | h_b] directly.
    wl = np.zeros((C2K, GW), np.float32)
    bl = np.zeros((1, GW), np.float32)
    for slot, gate in enumerate((0, 2, 3)):                       # i, g, o
        for d, (w_ih, bias) in enumerate(((w_ih_f, b_f), (w_ih_b, b_b))):
            col = (2 * slot + d) * HID
            wl[:C2, col:col + HID] = w_ih[gate * HID:(gate + 1) * HID, :].T
            bl[0, col:col + HID] = bias[gate * HID:(gate + 1) * HID]

    asb = lambda a: jnp.asarray(a, jnp.bfloat16)
    asf = lambda a: jnp.asarray(a, jnp.float32)
    return {"w1b": asb(w1b), "b1b": asf(b1b), "w2f": asb(w2f), "b2": asf(b2p),
            "wl": asb(wl), "bl": asf(bl)}


def init_params(key):
    ks = jax.random.split(key, 8)
    conv1_w = 0.1 * jax.random.normal(ks[0], (C1, 1, 3, 3), jnp.float32)
    conv1_b = 0.01 * jax.random.normal(ks[1], (C1,), jnp.float32)
    conv2_w = 0.05 * jax.random.normal(ks[2], (C2, C1, 3, 3), jnp.float32)
    conv2_b = 0.01 * jax.random.normal(ks[3], (C2,), jnp.float32)
    # PyTorch LSTM: W_ih (4H, F); b = b_ih + b_hh.  W_hh is dead (h0 = 0, 1 step).
    w_ih_f = 0.05 * jax.random.normal(ks[4], (4 * HID, C2), jnp.float32)
    w_ih_b = 0.05 * jax.random.normal(ks[5], (4 * HID, C2), jnp.float32)
    b_f = 0.01 * jax.random.normal(ks[6], (4 * HID,), jnp.float32)
    b_b = 0.01 * jax.random.normal(ks[7], (4 * HID,), jnp.float32)
    return _pack_params(conv1_w, conv1_b, conv2_w, conv2_b, w_ih_f, w_ih_b, b_f, b_b)


def _gather_conv_patches(x):
    # x: (B, 1, 16, 16) -> (B, 16, K1BP) bf16.  Row p holds, for each of the 9 conv2
    # taps of output position p, the 3x3 conv1 input patch (zeros for OOB taps).
    xp = jnp.pad(x[:, 0], ((0, 0), (1, 1), (1, 1)))               # conv1 pad=1 -> (B,18,18)
    g = xp[:, _ROWS, _COLS] * _VALID                              # (B, 16, 81)
    g = jnp.pad(g, ((0, 0), (0, 0), (0, K1BP - K1B)))
    return g.astype(jnp.bfloat16)


def _forward(params, x):
    B = x.shape[0]
    assert x.shape[1:] == (1, 16, 16), x.shape
    g = _gather_conv_patches(x)                                   # (B, 16, 128) bf16

    def wide(shape):                                              # weight/bias: same block
        return pl.BlockSpec(shape, lambda b, _s=shape: (0,) * len(_s))

    out = pl.pallas_call(
        _fused_kernel,
        out_shape=jax.ShapeDtypeStruct((B, 1, 2 * HID), jnp.float32),
        grid=(B,),
        in_specs=[
            pl.BlockSpec((1, 16, K1BP), lambda b: (b, 0, 0)),     # per-batch activations
            wide((K1BP, K2P)), wide((16, K2P)),                   # conv1 weight / bias
            wide((K2P, C2P)), wide((1, C2P)),                     # conv2 weight / bias
            wide((C2K, GW)), wide((1, GW)),                       # lstm gates weight / bias
        ],
        out_specs=pl.BlockSpec((1, 1, 2 * HID), lambda b: (b, 0, 0)),
        compiler_params=pltpu.CompilerParams(dimension_semantics=("parallel",)),
    )(g, params["w1b"], params["b1b"], params["w2f"], params["b2"],
      params["wl"], params["bl"])

    return out.reshape(B, 2 * HID)                                # (B, 400) = [h_f | h_b]


sound_stage_net_v2 = jax.jit(_forward)


if __name__ == "__main__":
    key = jax.random.PRNGKey(0)
    params = init_params(key)
    x = jax.random.normal(jax.random.fold_in(key, 123), (2, 1, 16, 16), jnp.float32)

    out = sound_stage_net_v2(params, x)
    out = jax.block_until_ready(out)

    assert out.shape == (2, 400), out.shape
    assert bool(jnp.all(jnp.isfinite(out)))
    print("KERNEL_OK")
</pallas_src>

<mosaic_0001>
module attributes {stable_mosaic.version = 11 : i64} {
  func.func @_fused_kernel(%arg0: i32, %arg1: memref<1x16x128xbf16, #tpu.memory_space<vmem>>, %arg2: memref<128x384xbf16, #tpu.memory_space<vmem>>, %arg3: memref<16x384xf32, #tpu.memory_space<vmem>>, %arg4: memref<384x512xbf16, #tpu.memory_space<vmem>>, %arg5: memref<1x512xf32, #tpu.memory_space<vmem>>, %arg6: memref<480x1200xbf16, #tpu.memory_space<vmem>>, %arg7: memref<1x1200xf32, #tpu.memory_space<vmem>>, %arg8: memref<1x1x400xf32, #tpu.memory_space<vmem>>) attributes {dimension_semantics = [#tpu.dimension_semantics<parallel>], iteration_bounds = array<i64: 2>, scalar_prefetch = 0 : i64, scratch_operands = 0 : i64, tpu.core_type = #tpu.core_type<tc>, window_params = [{transform_indices = @transform_0, window_bounds = array<i64: 1, 16, 128>}, {pipeline_mode = #tpu.pipeline_mode<synchronous>, transform_indices = @transform_1, window_bounds = array<i64: 128, 384>}, {pipeline_mode = #tpu.pipeline_mode<synchronous>, transform_indices = @transform_2, window_bounds = array<i64: 16, 384>}, {pipeline_mode = #tpu.pipeline_mode<synchronous>, transform_indices = @transform_3, window_bounds = array<i64: 384, 512>}, {pipeline_mode = #tpu.pipeline_mode<synchronous>, transform_indices = @transform_4, window_bounds = array<i64: 1, 512>}, {pipeline_mode = #tpu.pipeline_mode<synchronous>, transform_indices = @transform_5, window_bounds = array<i64: 480, 1200>}, {pipeline_mode = #tpu.pipeline_mode<synchronous>, transform_indices = @transform_6, window_bounds = array<i64: 1, 1200>}, {transform_indices = @transform_7, window_bounds = array<i64: 1, 1, 400>}]} {
    %c0 = arith.constant 0 : index
    %c0_0 = arith.constant 0 : index
    %c0_1 = arith.constant 0 : index
    %0 = vector.load %arg1[%c0, %c0_0, %c0_1] : memref<1x16x128xbf16, #tpu.memory_space<vmem>>, vector<1x16x128xbf16>
    %1 = vector.shape_cast %0 : vector<1x16x128xbf16> to vector<16x128xbf16>
    %c0_2 = arith.constant 0 : index
    %c0_3 = arith.constant 0 : index
    %2 = vector.load %arg2[%c0_2, %c0_3] : memref<128x384xbf16, #tpu.memory_space<vmem>>, vector<128x384xbf16>
    %cst = arith.constant dense<0.000000e+00> : vector<16x384xf32>
    %3 = tpu.matmul %1, %2, %cst {dimension_numbers = #tpu.dot_dimension_numbers<[1], [0], [0], [1], [0, 0, 1, 1], [], []>} : vector<16x128xbf16>, vector<128x384xbf16>, vector<16x384xf32> -> vector<16x384xf32>
    %c0_4 = arith.constant 0 : index
    %c0_5 = arith.constant 0 : index
    %4 = vector.load %arg3[%c0_4, %c0_5] : memref<16x384xf32, #tpu.memory_space<vmem>>, vector<16x384xf32>
    %5 = arith.addf %3, %4 : vector<16x384xf32>
    %cst_6 = arith.constant 0.000000e+00 : f32
    %6 = vector.broadcast %cst_6 : f32 to vector<16x384xf32>
    %7 = arith.maximumf %5, %6 : vector<16x384xf32>
    %8 = arith.truncf %7 : vector<16x384xf32> to vector<16x384xbf16>
    %c0_7 = arith.constant 0 : index
    %c0_8 = arith.constant 0 : index
    %9 = vector.load %arg4[%c0_7, %c0_8] : memref<384x512xbf16, #tpu.memory_space<vmem>>, vector<384x512xbf16>
    %cst_9 = arith.constant dense<0.000000e+00> : vector<16x512xf32>
    %10 = tpu.matmul %8, %9, %cst_9 {dimension_numbers = #tpu.dot_dimension_numbers<[1], [0], [0], [1], [0, 0, 1, 1], [], []>} : vector<16x384xbf16>, vector<384x512xbf16>, vector<16x512xf32> -> vector<16x512xf32>
    %c0_10 = arith.constant 0 : index
    %c0_11 = arith.constant 0 : index
    %11 = vector.load %arg5[%c0_10, %c0_11] : memref<1x512xf32, #tpu.memory_space<vmem>>, vector<1x512xf32>
    %12 = vector.broadcast %11 : vector<1x512xf32> to vector<16x512xf32>
    %13 = arith.addf %10, %12 : vector<16x512xf32>
    %cst_12 = arith.constant 0.000000e+00 : f32
    %14 = vector.broadcast %cst_12 : f32 to vector<16x512xf32>
    %15 = arith.maximumf %13, %14 : vector<16x512xf32>
    %cst_13 = arith.constant dense<0.000000e+00> : vector<512xf32>
    %16 = vector.multi_reduction <add>, %15, %cst_13 [0] : vector<16x512xf32> to vector<512xf32>
    %17 = vector.shape_cast %16 : vector<512xf32> to vector<1x512xf32>
    %cst_14 = arith.constant 1.600000e+01 : f32
    %18 = vector.broadcast %cst_14 : f32 to vector<1x512xf32>
    %19 = arith.divf %17, %18 : vector<1x512xf32>
    %20 = vector.extract_strided_slice %19 {offsets = [0, 0], sizes = [1, 480], strides = [1, 1]} : vector<1x512xf32> to vector<1x480xf32>
    %21 = arith.truncf %20 : vector<1x480xf32> to vector<1x480xbf16>
    %c0_15 = arith.constant 0 : index
    %c0_16 = arith.constant 0 : index
    %22 = vector.load %arg6[%c0_15, %c0_16] : memref<480x1200xbf16, #tpu.memory_space<vmem>>, vector<480x1200xbf16>
    %cst_17 = arith.constant dense<0.000000e+00> : vector<1x1200xf32>
    %23 = tpu.matmul %21, %22, %cst_17 {dimension_numbers = #tpu.dot_dimension_numbers<[1], [0], [0], [1], [0, 0, 1, 1], [], []>} : vector<1x480xbf16>, vector<480x1200xbf16>, vector<1x1200xf32> -> vector<1x1200xf32>
    %c0_18 = arith.constant 0 : index
    %c0_19 = arith.constant 0 : index
    %24 = vector.load %arg7[%c0_18, %c0_19] : memref<1x1200xf32, #tpu.memory_space<vmem>>, vector<1x1200xf32>
    %25 = arith.addf %23, %24 : vector<1x1200xf32>
    %26 = vector.extract_strided_slice %25 {offsets = [0, 0], sizes = [1, 400], strides = [1, 1]} : vector<1x1200xf32> to vector<1x400xf32>
    %27 = arith.negf %26 : vector<1x400xf32>
    %28 = math.exp %27 : vector<1x400xf32>
    %cst_20 = arith.constant 1.000000e+00 : f32
    %29 = vector.broadcast %cst_20 : f32 to vector<1x400xf32>
    %30 = arith.addf %29, %28 : vector<1x400xf32>
    %31 = arith.divf %29, %30 : vector<1x400xf32>
    %32 = vector.extract_strided_slice %25 {offsets = [0, 400], sizes = [1, 400], strides = [1, 1]} : vector<1x1200xf32> to vector<1x400xf32>
    %33 = math.tanh %32 : vector<1x400xf32>
    %34 = vector.extract_strided_slice %25 {offsets = [0, 800], sizes = [1, 400], strides = [1, 1]} : vector<1x1200xf32> to vector<1x400xf32>
    %35 = arith.negf %34 : vector<1x400xf32>
    %36 = math.exp %35 : vector<1x400xf32>
    %cst_21 = arith.constant 1.000000e+00 : f32
    %37 = vector.broadcast %cst_21 : f32 to vector<1x400xf32>
    %38 = arith.addf %37, %36 : vector<1x400xf32>
    %39 = arith.divf %37, %38 : vector<1x400xf32>
    %40 = arith.mulf %31, %33 : vector<1x400xf32>
    %41 = math.tanh %40 : vector<1x400xf32>
    %42 = arith.mulf %39, %41 : vector<1x400xf32>
    %c0_22 = arith.constant 0 : index
    %c0_23 = arith.constant 0 : index
    %c0_24 = arith.constant 0 : index
    %43 = vector.load %arg8[%c0_22, %c0_23, %c0_24] : memref<1x1x400xf32, #tpu.memory_space<vmem>>, vector<1x1x400xf32>
    %44 = vector.shape_cast %43 : vector<1x1x400xf32> to vector<1x400xf32>
    %45 = vector.shape_cast %42 : vector<1x400xf32> to vector<1x1x400xf32>
    tpu.vector_store %arg8[%c0_22, %c0_23, %c0_24], %45 {strides = array<i32>} : memref<1x1x400xf32, #tpu.memory_space<vmem>>, vector<1x1x400xf32>,
    return
  }
  func.func @transform_0(%arg0: i32) -> (i32, i32, i32) {
    %c0_i32 = arith.constant 0 : i32
    %c0_i32_0 = arith.constant 0 : i32
    %c0_i32_1 = arith.constant 0 : i32
    return %arg0, %c0_i32, %c0_i32_0 : i32, i32, i32
  }
  func.func @transform_1(%arg0: i32) -> (i32, i32) {
    %c0_i32 = arith.constant 0 : i32
    %c0_i32_0 = arith.constant 0 : i32
    %c0_i32_1 = arith.constant 0 : i32
    return %c0_i32, %c0_i32_0 : i32, i32
  }
  func.func @transform_2(%arg0: i32) -> (i32, i32) {
    %c0_i32 = arith.constant 0 : i32
    %c0_i32_0 = arith.constant 0 : i32
    %c0_i32_1 = arith.constant 0 : i32
    return %c0_i32, %c0_i32_0 : i32, i32
  }
  func.func @transform_3(%arg0: i32) -> (i32, i32) {
    %c0_i32 = arith.constant 0 : i32
    %c0_i32_0 = arith.constant 0 : i32
    %c0_i32_1 = arith.constant 0 : i32
    return %c0_i32, %c0_i32_0 : i32, i32
  }
  func.func @transform_4(%arg0: i32) -> (i32, i32) {
    %c0_i32 = arith.constant 0 : i32
    %c0_i32_0 = arith.constant 0 : i32
    %c0_i32_1 = arith.constant 0 : i32
    return %c0_i32, %c0_i32_0 : i32, i32
  }
  func.func @transform_5(%arg0: i32) -> (i32, i32) {
    %c0_i32 = arith.constant 0 : i32
    %c0_i32_0 = arith.constant 0 : i32
    %c0_i32_1 = arith.constant 0 : i32
    return %c0_i32, %c0_i32_0 : i32, i32
  }
  func.func @transform_6(%arg0: i32) -> (i32, i32) {
    %c0_i32 = arith.constant 0 : i32
    %c0_i32_0 = arith.constant 0 : i32
    %c0_i32_1 = arith.constant 0 : i32
    return %c0_i32, %c0_i32_0 : i32, i32
  }
  func.func @transform_7(%arg0: i32) -> (i32, i32, i32) {
    %c0_i32 = arith.constant 0 : i32
    %c0_i32_0 = arith.constant 0 : i32
    %c0_i32_1 = arith.constant 0 : i32
    return %arg0, %c0_i32, %c0_i32_0 : i32, i32, i32
  }
}

</mosaic_0001>

<bundles_post_ra>
// kernel: _forward.1
= control target key start
LH: loop header
LB: loop body
LE: loop exit
PB: predicated region body
PF: predicated region fallthrough
CT: control target
= control target key end

     0   :  { %s5042_s24 = smov 0   ;;  %s6491_s0 = inlined_call_operand.vmem [shape: bf16[2,16,128], index: 0, kind: input, shape index: {}]   ;;  %s6492_s1 = inlined_call_operand.vmem [shape: bf16[128,384], index: 1, kind: input, shape index: {}]   ;;  %s6493_s2 = inlined_call_operand.vmem [shape: f32[16,384], index: 2, kind: input, shape index: {}]   ;;  %s6494_s3 = inlined_call_operand.vmem [shape: bf16[384,512], index: 3, kind: input, shape index: {}]   ;;  %s6495_s4 = inlined_call_operand.vmem [shape: f32[1,512], index: 4, kind: input, shape index: {}]   ;;  %s6496_s5 = inlined_call_operand.vmem [shape: bf16[480,1200], index: 5, kind: input, shape index: {}]   ;;  %s6497_s6 = inlined_call_operand.vmem [shape: f32[1,1200], index: 6, kind: input, shape index: {}]   ;;  %s6498_s7 = inlined_call_operand.vmem [shape: f32[2,1,400], index: 7, kind: output, shape index: {}]  }
   0x1 LB: > { %s3823_s25 = sadd.s32 4294967295, %s4993_s24   ;;  %p3827_p0 = scmp.ge.s32.totalorder %s4993_s24, 1  ;;  %s4993_s24 = sphi %s5042_s24, %s17_s24  }
   0x2   : > { %p237_p1 = scmp.lt.s32.totalorder %s4993_s24, 3 }
   0x4   : > { %p238_p2 = pnand %p3827_p0, %p237_p1 }
   0x5   : > { %p268_p3 = scmp.lt.s32.totalorder (!%p238_p2), %s3823_s25, 1  ;;  %s4999_s28 = smov (!%p238_p2), 32  }
   0x6   : > { %241 = sbr.rel (%p238_p2) target bundleno = 1307 (0x51b), region = 48  ;;  %s5001_s29 = smov (!%p238_p2), 96  }
   0xb   : > { %v4312_v0 = vld [vmem:[%s6492_s1 + $0xac] ss:$12 sps:$4 sm:$0xff]   ;;  %v4995_v1 = vmov 0.0   ;;  %v4314_v2 = vld [vmem:[%s6492_s1 + $0xb0] ss:$12 sps:$4 sm:$0xff]   ;;  %vm4996_vm0 = vmmov 0  }
   0xc   : > { %4277 = vmatprep.subr.bf16.mxu1 %v4995_v1  ;;  %4293 = vmatprep.mubr.msk.bf16.mxu1 %vm4996_vm0, %v4995_v1  ;;  %v4315_v3 = vld [vmem:[%s6492_s1 + $0xa8] ss:$12 sps:$4 sm:$0xff]   ;;  %v4997_v5 = vmov 0   ;;  %v4318_v6 = vld [vmem:[%s6492_s1 + $0x98] ss:$12 sps:$4 sm:$0xff]   ;;  %s6500_s25 = smov (!%p268_p3, %s3823_s25), 1 }
   0xd   : > { %452 = vmatprep.subr.bf16.mxu0 %v4312_v0  ;;  %4278 = vmatpush3.bf16.msra.mxu1 %v4314_v2  ;;  %v4316_v4 = vld [vmem:[%s6492_s1 + $0x94] ss:$12 sps:$4 sm:$0xff]   ;;  %v4319_v7 = vld [vmem:[%s6492_s1 + $0x90] ss:$12 sps:$4 sm:$0xff]   ;;  %v4323_v10 = vld [vmem:[%s6492_s1 + $0x78] ss:$12 sps:$4 sm:$0xff]  }
   0xe   : > { %484 = vmatprep.mubr.bf16.mxu0 %v4997_v5  ;;  %453 = vmatpush1.bf16.msra.mxu0 %v4315_v3  ;;  %v4320_v8 = vld [vmem:[%s6492_s1 + $0x7c] ss:$12 sps:$4 sm:$0xff]   ;;  %v4322_v9 = vld [vmem:[%s6492_s1 + $0x80] ss:$12 sps:$4 sm:$0xff]   ;;  %v4324_v11 = vld [vmem:[%s6492_s1 + $0x64] ss:$12 sps:$4 sm:$0xff]  }
   0xf   : > { %4279 = vmatprep.subr.bf16.mxu1 %v4995_v1  ;;  %454 = vmatprep.subr.bf16.mxu0 %v4316_v4  ;;  %v4326_v12 = vld [vmem:[%s6492_s1 + $0x68] ss:$12 sps:$4 sm:$0xff]   ;;  %v4327_v13 = vld [vmem:[%s6492_s1 + $0x60] ss:$12 sps:$4 sm:$0xff]   ;;  %s4267_s8 = sshll.u32 %s6500_s25, 3  ;;  %vm3214_vm1 = vcmask 785408  }
  0x10   : > { %v4328_v14 = vld [vmem:[%s6492_s1 + $0x4c] ss:$12 sps:$4 sm:$0xff]   ;;  %v4330_v15 = vld [vmem:[%s6492_s1 + $0x50] ss:$12 sps:$4 sm:$0xff]   ;;  %v4331_v16 = vld [vmem:[%s6492_s1 + $0x48] ss:$12 sps:$4 sm:$0xff]   ;;  %s272_s17 = scalar_lea.vmem %s6491_s0, %s4267_s8 }
  0x11   : > { %4280 = vmatpush3.bf16.msra.mxu1 %v4318_v6  ;;  %v4332_v17 = vld [vmem:[%s6492_s1 + $0x34] ss:$12 sps:$4 sm:$0xff]   ;;  %v4334_v18 = vld [vmem:[%s6492_s1 + $0x38] ss:$12 sps:$4 sm:$0xff]   ;;  %v4335_v19 = vld [vmem:[%s6492_s1 + $0x30] ss:$12 sps:$4 sm:$0xff]  }
  0x12   : > { %455 = vmatpush1.bf16.msra.mxu0 %v4319_v7  ;;  %4281 = vmatprep.subr.bf16.mxu1 %v4995_v1  ;;  %v4336_v20 = vld [vmem:[%s6492_s1 + $0x1c] ss:$12 sps:$4 sm:$0xff]   ;;  %v4338_v21 = vld [vmem:[%s6492_s1 + $0x20] ss:$12 sps:$4 sm:$0xff]   ;;  %v4339_v22 = vld [vmem:[%s6492_s1 + $0x18] ss:$12 sps:$4 sm:$0xff]  }
  0x13   : > { %456 = vmatprep.subr.bf16.mxu0 %v4320_v8  ;;  %v4340_v23 = vld [vmem:[%s6492_s1 + $0x4] ss:$12 sps:$4 sm:$0xff]   ;;  %v4342_v24 = vld [vmem:[%s6492_s1 + $0x8] ss:$12 sps:$4 sm:$0xff]   ;;  %v4343_v25 = vld [vmem:[%s6492_s1] ss:$12 sps:$4 sm:$0xff]  }
  0x14   : > { %v4347_v26 = vld [vmem:[%s6494_s3 + $0xe4] ss:$16 sps:$4 sm:$0xff]   ;;  %v4369_v28 = vld [vmem:[%s6494_s3 + $0x2e0] ss:$16 sps:$4 sm:$0xff]   ;;  %vm3692_vm2 = vcmask 916480   ;;  %vm3720_vm3 = vcmask 261120  }
  0x15   : > { %4282 = vmatpush3.bf16.msra.mxu1 %v4322_v9  ;;  %v4344_v27 = vld [vmem:[%s272_s17] sm:$0xff]   ;;  %s4998_s17 = smov 112   ;;  %s3830_s30 = sshll.u32 %s6500_s25, 2 }
  0x16   : > { %457 = vmatpush1.bf16.msra.mxu0 %v4323_v10  ;;  %4283 = vmatprep.subr.bf16.mxu1 %v4995_v1  ;;  %v4371_v29 = vld [vmem:[%s6494_s3 + $0x2e4] ss:$16 sps:$4 sm:$0xff]   ;;  %v4345_v30 = vld [vmem:[%s6494_s3 + $0xe0] ss:$16 sps:$4 sm:$0xff]   ;;  %s276_s10 = scalar_lea.vmem %s6498_s7, %s3830_s30 }
  0x17   : > { %458 = vmatprep.subr.bf16.mxu0 %v4324_v11  ;;  %v4350_v31 = vld [vmem:[%s6494_s3 + $0xc4] ss:$16 sps:$4 sm:$0xff]   ;;  %v4375_v33 = vld [vmem:[%s6494_s3 + $0x2c0] ss:$16 sps:$4 sm:$0xff]   ;;  %v4419_v11 = vld [vmem:[%s6494_s3 + $0xec] ss:$16 sps:$4 sm:$0xff]  }
  0x18   : > { %v4377_v32 = vld [vmem:[%s6494_s3 + $0x2c4] ss:$16 sps:$4 sm:$0xff]   ;;  %v4348_v34 = vld [vmem:[%s6494_s3 + $0xc0] ss:$16 sps:$4 sm:$0xff]  }
  0x19   : > { %4284 = vmatpush3.bf16.msra.mxu1 %v4326_v12  ;;  %v4383_v35 = vld [vmem:[%s6494_s3 + $0x2a4] ss:$16 sps:$4 sm:$0xff]   ;;  %v4381_v37 = vld [vmem:[%s6494_s3 + $0x2a0] ss:$16 sps:$4 sm:$0xff]  }
  0x1a   : > { %459 = vmatpush1.bf16.msra.mxu0 %v4327_v13  ;;  %4285 = vmatprep.subr.bf16.mxu1 %v4995_v1  ;;  %v4353_v36 = vld [vmem:[%s6494_s3 + $0xa4] ss:$16 sps:$4 sm:$0xff]   ;;  %v4351_v38 = vld [vmem:[%s6494_s3 + $0xa0] ss:$16 sps:$4 sm:$0xff]   ;;  %v4425_v13 = vld [vmem:[%s6494_s3 + $0x2ec] ss:$16 sps:$4 sm:$0xff]  }
  0x1b   : > { %460 = vmatprep.subr.bf16.mxu0 %v4328_v14  ;;  %v4389_v39 = vld [vmem:[%s6494_s3 + $0x284] ss:$16 sps:$4 sm:$0xff]   ;;  %v4354_v41 = vld [vmem:[%s6494_s3 + $0x80] ss:$16 sps:$4 sm:$0xff]  }
  0x1c   : > { %v4356_v40 = vld [vmem:[%s6494_s3 + $0x84] ss:$16 sps:$4 sm:$0xff]   ;;  %v4387_v42 = vld [vmem:[%s6494_s3 + $0x280] ss:$16 sps:$4 sm:$0xff]  }
  0x1d   : > { %4286 = vmatpush3.bf16.msra.mxu1 %v4330_v15  ;;  %v4359_v43 = vld [vmem:[%s6494_s3 + $0x64] ss:$16 sps:$4 sm:$0xff]   ;;  %v4393_v45 = vld [vmem:[%s6494_s3 + $0x260] ss:$16 sps:$4 sm:$0xff]  }
  0x1e   : > { %461 = vmatpush1.bf16.msra.mxu0 %v4331_v16  ;;  %4287 = vmatprep.subr.bf16.mxu1 %v4995_v1  ;;  %v4395_v44 = vld [vmem:[%s6494_s3 + $0x264] ss:$16 sps:$4 sm:$0xff]   ;;  %v4357_v46 = vld [vmem:[%s6494_s3 + $0x60] ss:$16 sps:$4 sm:$0xff]  }
  0x1f   : > { %462 = vmatprep.subr.bf16.mxu0 %v4332_v17  ;;  %v4401_v47 = vld [vmem:[%s6494_s3 + $0x244] ss:$16 sps:$4 sm:$0xff]   ;;  %v4399_v49 = vld [vmem:[%s6494_s3 + $0x240] ss:$16 sps:$4 sm:$0xff]  }
  0x20   : > { %v4362_v48 = vld [vmem:[%s6494_s3 + $0x44] ss:$16 sps:$4 sm:$0xff]   ;;  %v4360_v50 = vld [vmem:[%s6494_s3 + $0x40] ss:$16 sps:$4 sm:$0xff]  }
  0x21   : > { %4288 = vmatpush3.bf16.msra.mxu1 %v4334_v18  ;;  %v4365_v51 = vld [vmem:[%s6494_s3 + $0x24] ss:$16 sps:$4 sm:$0xff]   ;;  %v4363_v52 = vld [vmem:[%s6494_s3 + $0x20] ss:$16 sps:$4 sm:$0xff]   ;;  %v313_v18 = vld [vmem:[%s6493_s2 + $0x8] sm:$0xff] }
  0x22   : > { %463 = vmatpush1.bf16.msra.mxu0 %v4335_v19  ;;  %4289 = vmatprep.subr.bf16.mxu1 %v4995_v1  ;;  %v4368_v53 = vld [vmem:[%s6494_s3 + $0x4] ss:$16 sps:$4 sm:$0xff]   ;;  %v4366_v54 = vld [vmem:[%s6494_s3] ss:$16 sps:$4 sm:$0xff]  }
  0x23   : > { %464 = vmatprep.subr.bf16.mxu0 %v4336_v20  ;;  %v4374_v55 = vld [vmem:[%s6494_s3 + $0x1e4] ss:$16 sps:$4 sm:$0xff]   ;;  %v4372_v56 = vld [vmem:[%s6494_s3 + $0x1e0] ss:$16 sps:$4 sm:$0xff]   ;;  %v317_v20 = vld [vmem:[%s6493_s2 + $0x28] sm:$0xff] }
  0x24   : > { %v4380_v57 = vld [vmem:[%s6494_s3 + $0x1c4] ss:$16 sps:$4 sm:$0xff]   ;;  %v4378_v58 = vld [vmem:[%s6494_s3 + $0x1c0] ss:$16 sps:$4 sm:$0xff]  }
  0x25   : > { %4290 = vmatpush3.bf16.msra.mxu1 %v4338_v21  ;;  %v4386_v59 = vld [vmem:[%s6494_s3 + $0x1a4] ss:$16 sps:$4 sm:$0xff]   ;;  %v4384_v60 = vld [vmem:[%s6494_s3 + $0x1a0] ss:$16 sps:$4 sm:$0xff]  }
  0x26   : > { %465 = vmatpush1.bf16.msra.mxu0 %v4339_v22  ;;  %4291 = vmatprep.subr.bf16.mxu1 %v4995_v1  ;;  %v4392_v61 = vld [vmem:[%s6494_s3 + $0x184] ss:$16 sps:$4 sm:$0xff]   ;;  %v4390_v62 = vld [vmem:[%s6494_s3 + $0x180] ss:$16 sps:$4 sm:$0xff]  }
  0x27   : > { %466 = vmatprep.subr.bf16.mxu0 %v4340_v23  ;;  %v4398_v63 = vld [vmem:[%s6494_s3 + $0x164] ss:$16 sps:$4 sm:$0xff]   ;;  %v4396_v0 = vld [vmem:[%s6494_s3 + $0x160] ss:$16 sps:$4 sm:$0xff]  }
  0x28   : > { %v4404_v1 = vld [vmem:[%s6494_s3 + $0x144] ss:$16 sps:$4 sm:$0xff]   ;;  %v4402_v3 = vld [vmem:[%s6494_s3 + $0x140] ss:$16 sps:$4 sm:$0xff]  }
  0x29   : > { %4292 = vmatpush3.bf16.msra.mxu1 %v4342_v24  ;;  %v4407_v2 = vld [vmem:[%s6494_s3 + $0x224] ss:$16 sps:$4 sm:$0xff]   ;;  %v4405_v4 = vld [vmem:[%s6494_s3 + $0x220] ss:$16 sps:$4 sm:$0xff]   ;;  %v315_v24 = vld [vmem:[%s6493_s2 + $0x18] sm:$0xff] }
  0x2a   : > { %467 = vmatpush1.bf16.msra.mxu0 %v4343_v25  ;;  %1186 = vmatprep.subr.bf16.mxu1 %v4371_v29  ;;  %v4410_v6 = vld [vmem:[%s6494_s3 + $0x124] ss:$16 sps:$4 sm:$0xff]   ;;  %v4408_v7 = vld [vmem:[%s6494_s3 + $0x120] ss:$16 sps:$4 sm:$0xff]  }
  0x2b   : > { %1143 = vmatprep.subr.bf16.mxu0 %v4347_v26  ;;  %v4411_v8 = vld [vmem:[%s6494_s3 + $0x200] ss:$16 sps:$4 sm:$0xff]   ;;  %v4413_v9 = vld [vmem:[%s6494_s3 + $0x204] ss:$16 sps:$4 sm:$0xff]  }
  0x2c   : > { %4294 = vmatmul.mubr.bf16.vlgmr.msra.gmra.mxu1 %v4344_v27  ;;  %v4416_v10 = vld [vmem:[%s6494_s3 + $0x104] ss:$16 sps:$4 sm:$0xff]   ;;  %v4414_v12 = vld [vmem:[%s6494_s3 + $0x100] ss:$16 sps:$4 sm:$0xff]  }
  0x2d   : > { %485 = vmatmul.mubr.bf16.vlgmr.msra.gmra.mxu0 %v4344_v27  ;;  %1187 = vmatpush1.bf16.msra.mxu1 %v4369_v28  ;;  %v314_v14 = vld [vmem:[%s6493_s2 + $0x10] sm:$0xff]  ;;  %v312_v16 = vld [vmem:[%s6493_s2] sm:$0xff] }
  0x2e   : > { %1144 = vmatpush1.bf16.msra.mxu0 %v4345_v30  ;;  %1188 = vmatprep.subr.bf16.mxu1 %v4377_v32  ;;  %v316_v29 = vld [vmem:[%s6493_s2 + $0x20] sm:$0xff] }
  0x2f   : > { %1145 = vmatprep.subr.bf16.mxu0 %v4350_v31  ;;  %1218 = vmatprep.mubr.bf16.mxu1 %v4997_v5 }
  0x31   : > { %1189 = vmatpush1.bf16.msra.mxu1 %v4375_v33 }
  0x32   : > { %1146 = vmatpush1.bf16.msra.mxu0 %v4348_v34  ;;  %1190 = vmatprep.subr.bf16.mxu1 %v4383_v35 }
  0x33   : > { %1147 = vmatprep.subr.bf16.mxu0 %v4353_v36 }
  0x35   : > { %1191 = vmatpush1.bf16.msra.mxu1 %v4381_v37 }
  0x36   : > { %1148 = vmatpush1.bf16.msra.mxu0 %v4351_v38  ;;  %1192 = vmatprep.subr.bf16.mxu1 %v4389_v39  ;;  %v4417_v39 = vld [vmem:[%s6494_s3 + $0xe8] ss:$16 sps:$4 sm:$0xff]  }
  0x37   : > { %1149 = vmatprep.subr.bf16.mxu0 %v4356_v40 }
  0x39   : > { %1193 = vmatpush1.bf16.msra.mxu1 %v4387_v42 }
  0x3a   : > { %1150 = vmatpush1.bf16.msra.mxu0 %v4354_v41  ;;  %1194 = vmatprep.subr.bf16.mxu1 %v4395_v44  ;;  %v4422_v41 = vld [vmem:[%s6494_s3 + $0xcc] ss:$16 sps:$4 sm:$0xff]  }
  0x3b   : > { %1151 = vmatprep.subr.bf16.mxu0 %v4359_v43 }
  0x3d   : > { %1195 = vmatpush1.bf16.msra.mxu1 %v4393_v45  ;;  %v4420_v45 = vld [vmem:[%s6494_s3 + $0xc8] ss:$16 sps:$4 sm:$0xff]  }
  0x3e   : > { %1152 = vmatpush1.bf16.msra.mxu0 %v4357_v46  ;;  %1196 = vmatprep.subr.bf16.mxu1 %v4401_v47  ;;  %v4423_v46 = vld [vmem:[%s6494_s3 + $0x2e8] ss:$16 sps:$4 sm:$0xff]   ;;  %v4428_v47 = vld [vmem:[%s6494_s3 + $0xac] ss:$16 sps:$4 sm:$0xff]  }
  0x3f   : > { %1153 = vmatprep.subr.bf16.mxu0 %v4362_v48  ;;  %v4431_v48 = vld [vmem:[%s6494_s3 + $0x2cc] ss:$16 sps:$4 sm:$0xff]  }
  0x41   : > { %1197 = vmatpush1.bf16.msra.mxu1 %v4399_v49  ;;  %v4426_v49 = vld [vmem:[%s6494_s3 + $0xa8] ss:$16 sps:$4 sm:$0xff]  }
  0x42   : > { %1154 = vmatpush1.bf16.msra.mxu0 %v4360_v50  ;;  %1198 = vmatprep.subr.bf16.mxu1 %v4407_v2  ;;  %v4429_v50 = vld [vmem:[%s6494_s3 + $0x2c8] ss:$16 sps:$4 sm:$0xff]   ;;  %v4458_v2 = vld [vmem:[%s6494_s3 + $0xc] ss:$16 sps:$4 sm:$0xff]  }
  0x43   : > { %1155 = vmatprep.subr.bf16.mxu0 %v4365_v51  ;;  %v4434_v51 = vld [vmem:[%s6494_s3 + $0x8c] ss:$16 sps:$4 sm:$0xff]  }
  0x45   : > { %1199 = vmatpush1.bf16.msra.mxu1 %v4405_v4  ;;  %v4456_v4 = vld [vmem:[%s6494_s3 + $0x8] ss:$16 sps:$4 sm:$0xff]  }
  0x46   : > { %1156 = vmatpush1.bf16.msra.mxu0 %v4363_v52  ;;  %1200 = vmatprep.subr.bf16.mxu1 %v4413_v9  ;;  %v4437_v52 = vld [vmem:[%s6494_s3 + $0x2ac] ss:$16 sps:$4 sm:$0xff]   ;;  %v4462_v9 = vld [vmem:[%s6494_s3 + $0x1e8] ss:$16 sps:$4 sm:$0xff]  }
  0x47   : > { %1157 = vmatprep.subr.bf16.mxu0 %v4368_v53  ;;  %v4432_v53 = vld [vmem:[%s6494_s3 + $0x88] ss:$16 sps:$4 sm:$0xff]  }
  0x49   : > { %1201 = vmatpush1.bf16.msra.mxu1 %v4411_v8  ;;  %v4467_v8 = vld [vmem:[%s6494_s3 + $0x20c] ss:$16 sps:$4 sm:$0xff]  }
  0x4a   : > { %1158 = vmatpush1.bf16.msra.mxu0 %v4366_v54  ;;  %1229 = vmatprep.subr.bf16.mxu1 %v4419_v11  ;;  %v4435_v54 = vld [vmem:[%s6494_s3 + $0x2a8] ss:$16 sps:$4 sm:$0xff]   ;;  %v4470_v11 = vld [vmem:[%s6494_s3 + $0x1cc] ss:$16 sps:$4 sm:$0xff]  }
  0x4b   : > { %1159 = vmatprep.subr.bf16.mxu0 %v4374_v55  ;;  %v4440_v55 = vld [vmem:[%s6494_s3 + $0x6c] ss:$16 sps:$4 sm:$0xff]  }
  0x4e   : > { %1160 = vmatpush2.bf16.msra.mxu0 %v4372_v56  ;;  %v4438_v56 = vld [vmem:[%s6494_s3 + $0x68] ss:$16 sps:$4 sm:$0xff]  }
  0x4f   : > { %1161 = vmatprep.subr.bf16.mxu0 %v4380_v57  ;;  %v4441_v57 = vld [vmem:[%s6494_s3 + $0x288] ss:$16 sps:$4 sm:$0xff]  }
  0x52   : > { %1162 = vmatpush2.bf16.msra.mxu0 %v4378_v58  ;;  %v4446_v58 = vld [vmem:[%s6494_s3 + $0x4c] ss:$16 sps:$4 sm:$0xff]  }
  0x53   : > { %1163 = vmatprep.subr.bf16.mxu0 %v4386_v59  ;;  %v4449_v59 = vld [vmem:[%s6494_s3 + $0x26c] ss:$16 sps:$4 sm:$0xff]  }
  0x56   : > { %1164 = vmatpush2.bf16.msra.mxu0 %v4384_v60  ;;  %v4444_v60 = vld [vmem:[%s6494_s3 + $0x48] ss:$16 sps:$4 sm:$0xff]  }
  0x57   : > { %1165 = vmatprep.subr.bf16.mxu0 %v4392_v61  ;;  %v4447_v61 = vld [vmem:[%s6494_s3 + $0x268] ss:$16 sps:$4 sm:$0xff]  }
  0x5a   : > { %1166 = vmatpush2.bf16.msra.mxu0 %v4390_v62  ;;  %v4452_v62 = vld [vmem:[%s6494_s3 + $0x2c] ss:$16 sps:$4 sm:$0xff]  }
  0x5b   : > { %1167 = vmatprep.subr.bf16.mxu0 %v4398_v63  ;;  %v4455_v63 = vld [vmem:[%s6494_s3 + $0x24c] ss:$16 sps:$4 sm:$0xff]  }
  0x5e   : > { %1168 = vmatpush2.bf16.msra.mxu0 %v4396_v0  ;;  %v4450_v0 = vld [vmem:[%s6494_s3 + $0x28] ss:$16 sps:$4 sm:$0xff]  }
  0x5f   : > { %1169 = vmatprep.subr.bf16.mxu0 %v4404_v1  ;;  %v4453_v1 = vld [vmem:[%s6494_s3 + $0x248] ss:$16 sps:$4 sm:$0xff]  }
  0x62   : > { %1170 = vmatpush2.bf16.msra.mxu0 %v4402_v3  ;;  %v4461_v3 = vld [vmem:[%s6494_s3 + $0x22c] ss:$16 sps:$4 sm:$0xff]  }
  0x63   : > { %1171 = vmatprep.subr.bf16.mxu0 %v4410_v6  ;;  %v4459_v6 = vld [vmem:[%s6494_s3 + $0x228] ss:$16 sps:$4 sm:$0xff]  }
  0x66   : > { %1172 = vmatpush2.bf16.msra.mxu0 %v4408_v7  ;;  %v4464_v7 = vld [vmem:[%s6494_s3 + $0x1ec] ss:$16 sps:$4 sm:$0xff]  }
  0x67   : > { %1173 = vmatprep.subr.bf16.mxu0 %v4416_v10  ;;  %v4465_v10 = vld [vmem:[%s6494_s3 + $0x208] ss:$16 sps:$4 sm:$0xff]  }
  0x6a   : > { %1174 = vmatpush2.bf16.msra.mxu0 %v4414_v12  ;;  %v4491_v12 = vld [vmem:[%s6496_s5 + $0x234] ss:$40 sps:$4 sm:$0xff]  }
  0x6b   : > { %1272 = vmatprep.subr.bf16.mxu0 %v4425_v13  ;;  %v4468_v13 = vld [vmem:[%s6494_s3 + $0x1c8] ss:$16 sps:$4 sm:$0xff]  }
  0xec   : > { %v529_v15 = vpop.f32.mrf.mxu1 }
  0xed   : > { %v486_v17 = vpop.f32.mrf.mxu0  ;;  %v530_v21 = vadd.f32 %v529_v15, %v314_v14  ;;  %v4489_v14 = vld [vmem:[%s6496_s5 + $0x230] ss:$40 sps:$4 sm:$0xff]   ;;  %v4473_v15 = vld [vmem:[%s6494_s3 + $0x1ac] ss:$16 sps:$4 sm:$0xff]  }
  0xee   : > { %v4295_v19 = vpop.f32.mrf.mxu1  ;;  %v487_v22 = vadd.f32 %v486_v17, %v312_v16  ;;  %v4494_v16 = vld [vmem:[%s6496_s5 + $0x1e4] ss:$40 sps:$4 sm:$0xff]   ;;  %v4471_v17 = vld [vmem:[%s6494_s3 + $0x1a8] ss:$16 sps:$4 sm:$0xff]  }
  0xef   : > { %v488_v23 = vpop.f32.mrf.mxu0  ;;  %v538_v32 = vmax.f32 %v530_v21, 0.0  ;;  %v4476_v19 = vld [vmem:[%s6494_s3 + $0x18c] ss:$16 sps:$4 sm:$0xff]   ;;  %v4474_v21 = vld [vmem:[%s6494_s3 + $0x188] ss:$16 sps:$4 sm:$0xff]  }
  0xf0   : > { %v489_v25 = vadd.f32 %v488_v23, %v313_v18  ;;  %v532_v26 = vpop.f32.mrf.mxu1  ;;  %v536_v33 = vmax.f32 %v487_v22, 0.0  ;;  %v4492_v18 = vld [vmem:[%s6496_s5 + $0x1e0] ss:$40 sps:$4 sm:$0xff]   ;;  %v4495_v22 = vld [vmem:[%s6496_s5 + $0x190] ss:$40 sps:$4 sm:$0xff]  }
  0xf1   : > { %v533_v27 = vadd.f32 %v532_v26, %v317_v20  ;;  %v490_v28 = vpop.f32.mrf.mxu0  ;;  %v4497_v20 = vld [vmem:[%s6496_s5 + $0x194] ss:$40 sps:$4 sm:$0xff]   ;;  %v4498_v26 = vld [vmem:[%s6496_s5 + $0x140] ss:$40 sps:$4 sm:$0xff]  }
  0xf2   : > { %v491_v30 = vadd.f32 %v490_v28, %v315_v24  ;;  %v4296_v31 = vpop.f32.mrf.mxu1  ;;  %v537_v36 = vmax.f32 %v489_v25, 0.0  ;;  %v4479_v23 = vld [vmem:[%s6494_s3 + $0x16c] ss:$16 sps:$4 sm:$0xff]   ;;  %v4477_v25 = vld [vmem:[%s6494_s3 + $0x168] ss:$16 sps:$4 sm:$0xff]  }
  0xf3   : > { %v541_v34 = vmax.f32 %v533_v27, 0.0  ;;  %v492_v35 = vpop.f32.mrf.mxu0  ;;  %v4500_v24 = vld [vmem:[%s6496_s5 + $0x144] ss:$40 sps:$4 sm:$0xff]   ;;  %v4503_v28 = vld [vmem:[%s6496_s5 + $0xf4] ss:$40 sps:$4 sm:$0xff]  }
  0xf4   : > { %v539_v37 = vmax.f32 %v491_v30, 0.0  ;;  %v493_v38 = vadd.f32 %v492_v35, %v316_v29  ;;  %v4482_v27 = vld [vmem:[%s6494_s3 + $0x14c] ss:$16 sps:$4 sm:$0xff]   ;;  %v4480_v29 = vld [vmem:[%s6494_s3 + $0x148] ss:$16 sps:$4 sm:$0xff]  }
  0xf5   : > { %v5305_v40 = vpack.c.bf16 %v541_v34, %v538_v32  ;;  %v4501_v30 = vld [vmem:[%s6496_s5 + $0xf0] ss:$40 sps:$4 sm:$0xff]   ;;  %v4485_v31 = vld [vmem:[%s6494_s3 + $0x12c] ss:$16 sps:$4 sm:$0xff]   ;;  %v4504_v34 = vld [vmem:[%s6496_s5 + $0xa0] ss:$40 sps:$4 sm:$0xff]  }
  0xf6   : > { %v540_v42 = vmax.f32 %v493_v38, 0.0  ;;  %v5310_v43 = vpack.c.bf16 %v539_v37, %v536_v33  ;;  %v4506_v32 = vld [vmem:[%s6496_s5 + $0xa4] ss:$40 sps:$4 sm:$0xff]   ;;  %v4483_v33 = vld [vmem:[%s6494_s3 + $0x128] ss:$16 sps:$4 sm:$0xff]  }
  0xf7   : > { %1219 = vmatmul.mubr.bf16.vlgmr.msra.gmra.mxu1 %v5305_v40  ;;  %v4488_v35 = vld [vmem:[%s6494_s3 + $0x10c] ss:$16 sps:$4 sm:$0xff]   ;;  %v4486_v37 = vld [vmem:[%s6494_s3 + $0x108] ss:$16 sps:$4 sm:$0xff]  }
  0xf8   : > { %v543_v44 = vpack.c.bf16 %v540_v42, %v537_v36  ;;  %1230 = vmatpush1.bf16.msra.mxu1 %v4417_v39  ;;  %v4509_v36 = vld [vmem:[%s6496_s5 + $0x54] ss:$40 sps:$4 sm:$0xff]   ;;  %v4507_v38 = vld [vmem:[%s6496_s5 + $0x50] ss:$40 sps:$4 sm:$0xff]   ;;  %v4512_v39 = vld [vmem:[%s6496_s5 + $0x4] ss:$40 sps:$4 sm:$0xff]  }
  0xf9   : > { %1231 = vmatprep.subr.bf16.mxu1 %v4422_v41  ;;  %v4515_v41 = vld [vmem:[%s6496_s5 + $0x4b4] ss:$40 sps:$4 sm:$0xff]   ;;  %v4513_v42 = vld [vmem:[%s6496_s5 + $0x4b0] ss:$40 sps:$4 sm:$0xff]  }
  0xfa   : > { %1175 = vmatprep.mubr.bf16.mxu0 %v543_v44  ;;  %1261 = vmatprep.mubr.bf16.mxu1 %v543_v44  ;;  %v4516_v44 = vld [vmem:[%s6496_s5 + $0x460] ss:$40 sps:$4 sm:$0xff]  }
  0xfb   : > { %1176 = vmatmul.mubr.bf16.vlgmr.msra.gmra.mxu0 %v5310_v43 }
  0xfc   : > { %1232 = vmatpush1.bf16.msra.mxu1 %v4420_v45  ;;  %1273 = vmatpush1.bf16.msra.mxu0 %v4423_v46  ;;  %v4521_v45 = vld [vmem:[%s6496_s5 + $0x414] ss:$40 sps:$4 sm:$0xff]   ;;  %v4519_v46 = vld [vmem:[%s6496_s5 + $0x410] ss:$40 sps:$4 sm:$0xff]  }
  0xfd   : > { %1233 = vmatprep.subr.bf16.mxu1 %v4428_v47  ;;  %1274 = vmatprep.subr.bf16.mxu0 %v4431_v48  ;;  %v4524_v47 = vld [vmem:[%s6496_s5 + $0x3c4] ss:$40 sps:$4 sm:$0xff]   ;;  %v4522_v48 = vld [vmem:[%s6496_s5 + $0x3c0] ss:$40 sps:$4 sm:$0xff]  }
  0xfe   : > { %1304 = vmatprep.mubr.bf16.mxu0 %v4997_v5  ;;  %v4443_v5 = vld [vmem:[%s6494_s3 + $0x28c] ss:$16 sps:$4 sm:$0xff]  }
 0x100   : > { %1234 = vmatpush1.bf16.msra.mxu1 %v4426_v49  ;;  %1275 = vmatpush1.bf16.msra.mxu0 %v4429_v50  ;;  %v4527_v49 = vld [vmem:[%s6496_s5 + $0x374] ss:$40 sps:$4 sm:$0xff]   ;;  %v4525_v50 = vld [vmem:[%s6496_s5 + $0x370] ss:$40 sps:$4 sm:$0xff]  }
 0x101   : > { %1235 = vmatprep.subr.bf16.mxu1 %v4434_v51  ;;  %1276 = vmatprep.subr.bf16.mxu0 %v4437_v52  ;;  %v4530_v51 = vld [vmem:[%s6496_s5 + $0x324] ss:$40 sps:$4 sm:$0xff]   ;;  %v4528_v52 = vld [vmem:[%s6496_s5 + $0x320] ss:$40 sps:$4 sm:$0xff]  }
 0x104   : > { %1236 = vmatpush1.bf16.msra.mxu1 %v4432_v53  ;;  %1277 = vmatpush1.bf16.msra.mxu0 %v4435_v54  ;;  %v4533_v53 = vld [vmem:[%s6496_s5 + $0x2d4] ss:$40 sps:$4 sm:$0xff]   ;;  %v4531_v54 = vld [vmem:[%s6496_s5 + $0x2d0] ss:$40 sps:$4 sm:$0xff]  }
 0x105   : > { %1237 = vmatprep.subr.bf16.mxu1 %v4440_v55  ;;  %1278 = vmatprep.subr.bf16.mxu0 %v4443_v5  ;;  %v4534_v55 = vld [vmem:[%s6496_s5 + $0x280] ss:$40 sps:$4 sm:$0xff]   ;;  %v4536_v5 = vld [vmem:[%s6496_s5 + $0x284] ss:$40 sps:$4 sm:$0xff]  }
 0x108   : > { %1238 = vmatpush1.bf16.msra.mxu1 %v4438_v56  ;;  %1279 = vmatpush1.bf16.msra.mxu0 %v4441_v57  ;;  %v4539_v56 = vld [vmem:[%s6496_s5 + $0x734] ss:$40 sps:$4 sm:$0xff]  }
 0x109   : > { %1239 = vmatprep.subr.bf16.mxu1 %v4446_v58  ;;  %1280 = vmatprep.subr.bf16.mxu0 %v4449_v59  ;;  %v4542_v57 = vld [vmem:[%s6496_s5 + $0x73c] ss:$40 sps:$4 sm:$0xff]   ;;  %v4537_v58 = vld [vmem:[%s6496_s5 + $0x730] ss:$40 sps:$4 sm:$0xff]  }
 0x10a   : > { %v4545_v59 = vld [vmem:[%s6496_s5 + $0x6e4] ss:$40 sps:$4 sm:$0xff]  }
 0x10c   : > { %1240 = vmatpush1.bf16.msra.mxu1 %v4444_v60  ;;  %1281 = vmatpush1.bf16.msra.mxu0 %v4447_v61  ;;  %v4543_v60 = vld [vmem:[%s6496_s5 + $0x6e0] ss:$40 sps:$4 sm:$0xff]   ;;  %v4551_v61 = vld [vmem:[%s6496_s5 + $0x694] ss:$40 sps:$4 sm:$0xff]  }
 0x10d   : > { %1241 = vmatprep.subr.bf16.mxu1 %v4452_v62  ;;  %1282 = vmatprep.subr.bf16.mxu0 %v4455_v63  ;;  %v4549_v62 = vld [vmem:[%s6496_s5 + $0x690] ss:$40 sps:$4 sm:$0xff]   ;;  %v4557_v63 = vld [vmem:[%s6496_s5 + $0x644] ss:$40 sps:$4 sm:$0xff]  }
 0x110   : > { %1242 = vmatpush1.bf16.msra.mxu1 %v4450_v0  ;;  %1283 = vmatpush1.bf16.msra.mxu0 %v4453_v1  ;;  %v4555_v0 = vld [vmem:[%s6496_s5 + $0x640] ss:$40 sps:$4 sm:$0xff]   ;;  %v4563_v1 = vld [vmem:[%s6496_s5 + $0x5f4] ss:$40 sps:$4 sm:$0xff]  }
 0x111   : > { %1243 = vmatprep.subr.bf16.mxu1 %v4458_v2  ;;  %1284 = vmatprep.subr.bf16.mxu0 %v4461_v3  ;;  %v4561_v2 = vld [vmem:[%s6496_s5 + $0x5f0] ss:$40 sps:$4 sm:$0xff]   ;;  %v4569_v3 = vld [vmem:[%s6496_s5 + $0x5a4] ss:$40 sps:$4 sm:$0xff]  }
 0x114   : > { %1244 = vmatpush1.bf16.msra.mxu1 %v4456_v4  ;;  %1285 = vmatpush1.bf16.msra.mxu0 %v4459_v6  ;;  %v4567_v4 = vld [vmem:[%s6496_s5 + $0x5a0] ss:$40 sps:$4 sm:$0xff]   ;;  %v4575_v6 = vld [vmem:[%s6496_s5 + $0x554] ss:$40 sps:$4 sm:$0xff]  }
 0x115   : > { %1245 = vmatprep.subr.bf16.mxu1 %v4464_v7  ;;  %1286 = vmatprep.subr.bf16.mxu0 %v4467_v8  ;;  %v4573_v7 = vld [vmem:[%s6496_s5 + $0x550] ss:$40 sps:$4 sm:$0xff]   ;;  %v4581_v8 = vld [vmem:[%s6496_s5 + $0x504] ss:$40 sps:$4 sm:$0xff]  }
 0x118   : > { %1246 = vmatpush2.bf16.msra.mxu1 %v4462_v9  ;;  %1287 = vmatpush1.bf16.msra.mxu0 %v4465_v10  ;;  %v4579_v9 = vld [vmem:[%s6496_s5 + $0x500] ss:$40 sps:$4 sm:$0xff]   ;;  %v4587_v10 = vld [vmem:[%s6496_s5 + $0x914] ss:$40 sps:$4 sm:$0xff]  }
 0x119   : > { %1247 = vmatprep.subr.bf16.mxu1 %v4470_v11  ;;  %3218 = vmatprep.subr.bf16.mxu0 %v4491_v12  ;;  %v4585_v11 = vld [vmem:[%s6496_s5 + $0x910] ss:$40 sps:$4 sm:$0xff]   ;;  %v4593_v12 = vld [vmem:[%s6496_s5 + $0x8c4] ss:$40 sps:$4 sm:$0xff]  }
 0x11b   : > { %1305 = vmatmul.mubr.bf16.vlgmr.msra.gmra.mxu0 %v5305_v40  ;;  %v4510_v40 = vld [vmem:[%s6496_s5] ss:$40 sps:$4 sm:$0xff]  }
 0x11c   : > { %1248 = vmatpush2.bf16.msra.mxu1 %v4468_v13  ;;  %3219 = vmatpush1.bf16.msra.mxu0 %v4489_v14  ;;  %v4591_v13 = vld [vmem:[%s6496_s5 + $0x8c0] ss:$40 sps:$4 sm:$0xff]   ;;  %v4599_v14 = vld [vmem:[%s6496_s5 + $0x874] ss:$40 sps:$4 sm:$0xff]  }
 0x11d   : > { %1249 = vmatprep.subr.bf16.mxu1 %v4473_v15  ;;  %3220 = vmatprep.subr.bf16.mxu0 %v4494_v16  ;;  %v4597_v15 = vld [vmem:[%s6496_s5 + $0x870] ss:$40 sps:$4 sm:$0xff]   ;;  %v4605_v16 = vld [vmem:[%s6496_s5 + $0x824] ss:$40 sps:$4 sm:$0xff]  }
 0x120   : > { %1250 = vmatpush2.bf16.msra.mxu1 %v4471_v17  ;;  %3221 = vmatpush1.bf16.msra.mxu0 %v4492_v18  ;;  %v4603_v17 = vld [vmem:[%s6496_s5 + $0x820] ss:$40 sps:$4 sm:$0xff]   ;;  %v4611_v18 = vld [vmem:[%s6496_s5 + $0x7d4] ss:$40 sps:$4 sm:$0xff]  }
 0x121   : > { %1251 = vmatprep.subr.bf16.mxu1 %v4476_v19  ;;  %3222 = vmatprep.subr.bf16.mxu0 %v4497_v20  ;;  %v4609_v19 = vld [vmem:[%s6496_s5 + $0x7d0] ss:$40 sps:$4 sm:$0xff]   ;;  %v4617_v20 = vld [vmem:[%s6496_s5 + $0x784] ss:$40 sps:$4 sm:$0xff]  }
 0x124   : > { %1252 = vmatpush2.bf16.msra.mxu1 %v4474_v21  ;;  %3223 = vmatpush1.bf16.msra.mxu0 %v4495_v22  ;;  %v4615_v21 = vld [vmem:[%s6496_s5 + $0x780] ss:$40 sps:$4 sm:$0xff]   ;;  %v4623_v22 = vld [vmem:[%s6496_s5 + $0x23c] ss:$40 sps:$4 sm:$0xff]  }
 0x125   : > { %1253 = vmatprep.subr.bf16.mxu1 %v4479_v23  ;;  %3224 = vmatprep.subr.bf16.mxu0 %v4500_v24  ;;  %v643_v23 = vlaneseq }
 0x127   : > { %v5636_v24 = vshrl.u32 %v643_v23, 7  ;;  %vm3767_vm4 = vcmp.lt.s32.totalorder %v643_v23, 400 }
 0x128   : > { %1254 = vmatpush2.bf16.msra.mxu1 %v4477_v25  ;;  %3225 = vmatpush1.bf16.msra.mxu0 %v4498_v26  ;;  %v5644_v26 = vld [vmem:[%s6495_s4] sm:$0xf] }
 0x129   : > { %1255 = vmatprep.subr.bf16.mxu1 %v4482_v27  ;;  %3226 = vmatprep.subr.bf16.mxu0 %v4503_v28  ;;  %v5639_v25 = vsub.s32 0, %v5636_v24  ;;  %v5647_v27 = vsub.s32 1, %v5636_v24 }
 0x12c   : > { %1256 = vmatpush2.bf16.msra.mxu1 %v4480_v29  ;;  %3227 = vmatpush1.bf16.msra.mxu0 %v4501_v30  ;;  %v646_v29 = vrot.slane %v5644_v26, %v5639_v25  ;;  %v650_v30 = vrot.slane %v5644_v26, %v5647_v27 }
 0x12d   : > { %1257 = vmatprep.subr.bf16.mxu1 %v4485_v31  ;;  %3228 = vmatprep.subr.bf16.mxu0 %v4506_v32 }
 0x130   : > { %1258 = vmatpush2.bf16.msra.mxu1 %v4483_v33  ;;  %3229 = vmatpush1.bf16.msra.mxu0 %v4504_v34 }
 0x131   : > { %1259 = vmatprep.subr.bf16.mxu1 %v4488_v35  ;;  %3230 = vmatprep.subr.bf16.mxu0 %v4509_v36 }
 0x134   : > { %1260 = vmatpush2.bf16.msra.mxu1 %v4486_v37  ;;  %3231 = vmatpush1.bf16.msra.mxu0 %v4507_v38 }
 0x135   : > { %3232 = vmatprep.subr.bf16.mxu0 %v4512_v39  ;;  %3259 = vmatprep.subr.bf16.mxu1 %v4539_v56 }
 0x137   : > { %1262 = vmatmul.mubr.bf16.vlgmr.msra.gmra.mxu1 %v5310_v43  ;;  %v4518_v43 = vld [vmem:[%s6496_s5 + $0x464] ss:$40 sps:$4 sm:$0xff]  }
 0x138   : > { %3233 = vmatpush1.bf16.msra.mxu0 %v4510_v40  ;;  %3260 = vmatpush1.bf16.msra.mxu1 %v4537_v58 }
 0x139   : > { %3234 = vmatprep.subr.bf16.mxu0 %v4515_v41  ;;  %3261 = vmatprep.subr.bf16.mxu1 %v4545_v59 }
 0x13c   : > { %3235 = vmatpush2.bf16.msra.mxu0 %v4513_v42  ;;  %3262 = vmatpush1.bf16.msra.mxu1 %v4543_v60 }
 0x13d   : > { %3236 = vmatprep.subr.bf16.mxu0 %v4518_v43  ;;  %3263 = vmatprep.subr.bf16.mxu1 %v4551_v61 }
 0x140   : > { %3237 = vmatpush2.bf16.msra.mxu0 %v4516_v44  ;;  %3264 = vmatpush1.bf16.msra.mxu1 %v4549_v62 }
 0x141   : > { %3238 = vmatprep.subr.bf16.mxu0 %v4521_v45  ;;  %3265 = vmatprep.subr.bf16.mxu1 %v4557_v63 }
 0x144   : > { %3239 = vmatpush2.bf16.msra.mxu0 %v4519_v46  ;;  %3266 = vmatpush1.bf16.msra.mxu1 %v4555_v0 }
 0x145   : > { %3240 = vmatprep.subr.bf16.mxu0 %v4524_v47  ;;  %3267 = vmatprep.subr.bf16.mxu1 %v4563_v1 }
 0x148   : > { %3241 = vmatpush2.bf16.msra.mxu0 %v4522_v48  ;;  %3268 = vmatpush1.bf16.msra.mxu1 %v4561_v2  ;;  %v4540_v2 = vld [vmem:[%s6496_s5 + $0x738] ss:$40 sps:$4 sm:$0xff]  }
 0x149   : > { %3242 = vmatprep.subr.bf16.mxu0 %v4527_v49  ;;  %3269 = vmatprep.subr.bf16.mxu1 %v4569_v3 }
 0x14c   : > { %3243 = vmatpush2.bf16.msra.mxu0 %v4525_v50  ;;  %3270 = vmatpush1.bf16.msra.mxu1 %v4567_v4  ;;  %v4548_v4 = vld [vmem:[%s6496_s5 + $0x6ec] ss:$40 sps:$4 sm:$0xff]  }
 0x14d   : > { %3244 = vmatprep.subr.bf16.mxu0 %v4530_v51  ;;  %3271 = vmatprep.subr.bf16.mxu1 %v4575_v6  ;;  %v4546_v6 = vld [vmem:[%s6496_s5 + $0x6e8] ss:$40 sps:$4 sm:$0xff]  }
 0x150   : > { %3245 = vmatpush2.bf16.msra.mxu0 %v4528_v52  ;;  %3272 = vmatpush1.bf16.msra.mxu1 %v4573_v7  ;;  %v4554_v7 = vld [vmem:[%s6496_s5 + $0x69c] ss:$40 sps:$4 sm:$0xff]  }
 0x151   : > { %3246 = vmatprep.subr.bf16.mxu0 %v4533_v53  ;;  %3273 = vmatprep.subr.bf16.mxu1 %v4581_v8  ;;  %v4552_v8 = vld [vmem:[%s6496_s5 + $0x698] ss:$40 sps:$4 sm:$0xff]  }
 0x154   : > { %3247 = vmatpush2.bf16.msra.mxu0 %v4531_v54  ;;  %3274 = vmatpush1.bf16.msra.mxu1 %v4579_v9  ;;  %v4560_v9 = vld [vmem:[%s6496_s5 + $0x64c] ss:$40 sps:$4 sm:$0xff]  }
 0x155   : > { %3248 = vmatprep.subr.bf16.mxu0 %v4536_v5  ;;  %3279 = vmatprep.subr.bf16.mxu1 %v4587_v10  ;;  %v4558_v10 = vld [vmem:[%s6496_s5 + $0x648] ss:$40 sps:$4 sm:$0xff]  }
 0x158   : > { %3249 = vmatpush2.bf16.msra.mxu0 %v4534_v55  ;;  %3280 = vmatpush2.bf16.msra.mxu1 %v4585_v11  ;;  %v4566_v11 = vld [vmem:[%s6496_s5 + $0x5fc] ss:$40 sps:$4 sm:$0xff]  }
 0x159   : > { %3341 = vmatprep.subr.bf16.mxu0 %v4542_v57  ;;  %3281 = vmatprep.subr.bf16.mxu1 %v4593_v12  ;;  %v4564_v12 = vld [vmem:[%s6496_s5 + $0x5f8] ss:$40 sps:$4 sm:$0xff]  }
 0x15c   : > { %3282 = vmatpush2.bf16.msra.mxu1 %v4591_v13  ;;  %v4572_v13 = vld [vmem:[%s6496_s5 + $0x5ac] ss:$40 sps:$4 sm:$0xff]  }
 0x15d   : > { %3283 = vmatprep.subr.bf16.mxu1 %v4599_v14  ;;  %v4570_v14 = vld [vmem:[%s6496_s5 + $0x5a8] ss:$40 sps:$4 sm:$0xff]  }
 0x160   : > { %3284 = vmatpush2.bf16.msra.mxu1 %v4597_v15  ;;  %v4578_v15 = vld [vmem:[%s6496_s5 + $0x55c] ss:$40 sps:$4 sm:$0xff]  }
 0x161   : > { %3285 = vmatprep.subr.bf16.mxu1 %v4605_v16  ;;  %v4576_v16 = vld [vmem:[%s6496_s5 + $0x558] ss:$40 sps:$4 sm:$0xff]  }
 0x164   : > { %3286 = vmatpush2.bf16.msra.mxu1 %v4603_v17  ;;  %v653_v17 = vsub.s32 2, %v5636_v24 }
 0x165   : > { %3287 = vmatprep.subr.bf16.mxu1 %v4611_v18  ;;  %v4584_v18 = vld [vmem:[%s6496_s5 + $0x50c] ss:$40 sps:$4 sm:$0xff]  }
 0x168   : > { %3288 = vmatpush2.bf16.msra.mxu1 %v4609_v19  ;;  %v657_v19 = vsub.s32 3, %v5636_v24 }
 0x169   : > { %3289 = vmatprep.subr.bf16.mxu1 %v4617_v20 }
 0x16c   : > { %3290 = vmatpush2.bf16.msra.mxu1 %v4615_v21  ;;  %v654_v21 = vrot.slane %v5644_v26, %v653_v17 }
 0x16d   : > { %3300 = vmatprep.subr.bf16.mxu1 %v4623_v22  ;;  %v4582_v22 = vld [vmem:[%s6496_s5 + $0x508] ss:$40 sps:$4 sm:$0xff]  }
 0x1b7   : > { %v1220_v28 = vpop.f32.mrf.mxu1 }
 0x1b9   : > { %v1222_v31 = vpop.f32.mrf.mxu1 }
 0x1bb   : > { %v1177_v32 = vpop.f32.mrf.mxu0  ;;  %v1224_v36 = vpop.f32.mrf.mxu1 }
 0x1bc   : > { %v1178_v33 = vadd.f32 %v1177_v32, %v646_v29 }
 0x1bd   : > { %v1179_v34 = vpop.f32.mrf.mxu0  ;;  %v1226_v44 = vpop.f32.mrf.mxu1 }
 0x1be   : > { %v1180_v35 = vadd.f32 %v1179_v34, %v650_v30  ;;  %v1221_v38 = vadd.f32 %v1220_v28, %v1178_v33  ;;  %v4590_v28 = vld [vmem:[%s6496_s5 + $0x91c] ss:$40 sps:$4 sm:$0xff]   ;;  %v4588_v33 = vld [vmem:[%s6496_s5 + $0x918] ss:$40 sps:$4 sm:$0xff]  }
 0x1bf   : > { %v1181_v37 = vpop.f32.mrf.mxu0 }
 0x1c0   : > { %v1182_v39 = vadd.f32 %v1181_v37, %v646_v29  ;;  %v1223_v41 = vadd.f32 %v1222_v31, %v1180_v35  ;;  %v1315_v45 = vmax.f32 %v1221_v38, 0.0  ;;  %v658_v29 = vrot.slane %v5644_v26, %v657_v19  ;;  %v4596_v35 = vld [vmem:[%s6496_s5 + $0x8cc] ss:$40 sps:$4 sm:$0xff]   ;;  %v4594_v26 = vld [vmem:[%s6496_s5 + $0x8c8] ss:$40 sps:$4 sm:$0xff]  }
 0x1c1   : > { %v1183_v40 = vpop.f32.mrf.mxu0 }
 0x1c2   : > { %v1225_v42 = vadd.f32 %v1224_v36, %v1182_v39  ;;  %v1184_v43 = vadd.f32 %v1183_v40, %v650_v30  ;;  %v1316_v48 = vmax.f32 %v1223_v41, 0.0 }
 0x1c4   : > { %v1319_v46 = vmax.f32 %v1225_v42, 0.0  ;;  %v1227_v47 = vadd.f32 %v1226_v44, %v1184_v43  ;;  %v4602_v42 = vld [vmem:[%s6496_s5 + $0x87c] ss:$40 sps:$4 sm:$0xff]  }
 0x1c6   : > { %v1323_v49 = vadd.f32 %v1319_v46, %v1315_v45  ;;  %v1320_v50 = vmax.f32 %v1227_v47, 0.0 }
 0x1c8   : > { %v1324_v51 = vrot.slane %v1323_v49, 4  ;;  %v1330_v52 = vadd.f32 %v1320_v50, %v1316_v48  ;;  %v4600_v50 = vld [vmem:[%s6496_s5 + $0x878] ss:$40 sps:$4 sm:$0xff]  }
 0x1ca   : > { %v1325_v53 = vadd.f32 %v1324_v51, %v1323_v49  ;;  %v1331_v54 = vrot.slane %v1330_v52, 4  ;;  %v4608_v51 = vld [vmem:[%s6496_s5 + $0x82c] ss:$40 sps:$4 sm:$0xff]  }
 0x1cc   : > { %v1326_v55 = vrot.slane %v1325_v53, 2  ;;  %v1332_v5 = vadd.f32 %v1331_v54, %v1330_v52 }
 0x1ce   : > { %v1327_v56 = vadd.f32 %v1326_v55, %v1325_v53  ;;  %v1333_v57 = vrot.slane %v1332_v5, 2 }
 0x1d0   : > { %v1328_v58 = vrot.slane %v1327_v56, 1  ;;  %v1334_v59 = vadd.f32 %v1333_v57, %v1332_v5  ;;  %v4614_v57 = vld [vmem:[%s6496_s5 + $0x7dc] ss:$40 sps:$4 sm:$0xff]  }
 0x1d2   : > { %v1329_v60 = vadd.f32 %v1328_v58, %v1327_v56  ;;  %v1335_v61 = vrot.slane %v1334_v59, 1  ;;  %v4606_v56 = vld [vmem:[%s6496_s5 + $0x828] ss:$40 sps:$4 sm:$0xff]  }
 0x1d4   : > { %v1336_v62 = vadd.f32 %v1335_v61, %v1334_v59  ;;  %v1352_v63 = vmul.f32 0.0625, %v1329_v60 }
 0x1d6   : > { %v1353_v0 = vmul.f32 0.0625, %v1336_v62  ;;  %v5658_v3 = vpack.c.bf16 %v1352_v63, %v1352_v63  ;;  %v4612_v62 = vld [vmem:[%s6496_s5 + $0x7d8] ss:$40 sps:$4 sm:$0xff]   ;;  %v4620_v63 = vld [vmem:[%s6496_s5 + $0x78c] ss:$40 sps:$4 sm:$0xff]  }
 0x1d8   : > { %v5653_v1 = vpack.c.bf16 %v1353_v0, %v1353_v0 }
 0x1da   : > { %3250 = vmatprep.mubr.bf16.mxu0 %v5653_v1 }
 0x1db   : > { %3251 = vmatmul.mubr.bf16.vlgmr.msra.gmra.mxu0 %v5658_v3  ;;  %v1306_v20 = vpop.f32.mrf.mxu0 }
 0x1dc   : > { %3342 = vmatpush1.bf16.msra.mxu0 %v4540_v2 }
 0x1dd   : > { %3343 = vmatprep.subr.bf16.mxu0 %v4548_v4  ;;  %v1308_v30 = vpop.f32.mrf.mxu0 }
 0x1df   : > { %v1310_v37 = vpop.f32.mrf.mxu0 }
 0x1e0   : > { %3344 = vmatpush1.bf16.msra.mxu0 %v4546_v6 }
 0x1e1   : > { %3345 = vmatprep.subr.bf16.mxu0 %v4554_v7  ;;  %v1312_v46 = vpop.f32.mrf.mxu0  ;;  %v4618_v7 = vld [vmem:[%s6496_s5 + $0x788] ss:$40 sps:$4 sm:$0xff]  }
 0x1e4   : > { %3346 = vmatpush1.bf16.msra.mxu0 %v4552_v8  ;;  %v4626_v8 = vld [vmem:[%s6496_s5 + $0x244] ss:$40 sps:$4 sm:$0xff]  }
 0x1e5   : > { %3347 = vmatprep.subr.bf16.mxu0 %v4560_v9 }
 0x1e8   : > { %3348 = vmatpush1.bf16.msra.mxu0 %v4558_v10 }
 0x1e9   : > { %3349 = vmatprep.subr.bf16.mxu0 %v4566_v11 }
 0x1ec   : > { %3350 = vmatpush1.bf16.msra.mxu0 %v4564_v12 }
 0x1ed   : > { %3351 = vmatprep.subr.bf16.mxu0 %v4572_v13 }
 0x1f0   : > { %3352 = vmatpush1.bf16.msra.mxu0 %v4570_v14 }
 0x1f1   : > { %3353 = vmatprep.subr.bf16.mxu0 %v4578_v15  ;;  %v4621_v15 = vld [vmem:[%s6496_s5 + $0x238] ss:$40 sps:$4 sm:$0xff]  }
 0x1f4   : > { %3354 = vmatpush1.bf16.msra.mxu0 %v4576_v16  ;;  %v4624_v16 = vld [vmem:[%s6496_s5 + $0x240] ss:$40 sps:$4 sm:$0xff]  }
 0x1f5   : > { %3355 = vmatprep.subr.bf16.mxu0 %v4584_v18 }
 0x1f7   : > { %v1263_v31 = vpop.f32.mrf.mxu1 }
 0x1f8   : > { %v1264_v32 = vadd.f32 %v1263_v31, %v654_v21  ;;  %3356 = vmatpush1.bf16.msra.mxu0 %v4582_v22  ;;  %v4627_v22 = vld [vmem:[%s6496_s5 + $0x1e8] ss:$40 sps:$4 sm:$0xff]   ;;  %v4633_v31 = vld [vmem:[%s6496_s5 + $0x198] ss:$40 sps:$4 sm:$0xff]  }
 0x1f9   : > { %v1265_v34 = vpop.f32.mrf.mxu1  ;;  %3361 = vmatprep.subr.bf16.mxu0 %v4590_v28  ;;  %v4630_v28 = vld [vmem:[%s6496_s5 + $0x1f0] ss:$40 sps:$4 sm:$0xff]  }
 0x1fa   : > { %v1266_v36 = vadd.f32 %v1265_v34, %v658_v29  ;;  %v1307_v39 = vadd.f32 %v1306_v20, %v1264_v32  ;;  %v4629_v20 = vld [vmem:[%s6496_s5 + $0x1ec] ss:$40 sps:$4 sm:$0xff]   ;;  %v4636_v32 = vld [vmem:[%s6496_s5 + $0x1a0] ss:$40 sps:$4 sm:$0xff]  }
 0x1fb   : > { %v1267_v38 = vpop.f32.mrf.mxu1  ;;  %v4644_v34 = vld [vmem:[%s6496_s5 + $0x154] ss:$40 sps:$4 sm:$0xff]  }
 0x1fc   : > { %v1268_v40 = vadd.f32 %v1267_v38, %v654_v21  ;;  %3362 = vmatpush2.bf16.msra.mxu0 %v4588_v33  ;;  %v1309_v43 = vadd.f32 %v1308_v30, %v1266_v36  ;;  %v1317_v47 = vmax.f32 %v1307_v39, 0.0  ;;  %v4632_v21 = vld [vmem:[%s6496_s5 + $0x1f4] ss:$40 sps:$4 sm:$0xff]   ;;  %v4638_v30 = vld [vmem:[%s6496_s5 + $0x1a4] ss:$40 sps:$4 sm:$0xff]  }
 0x1fd   : > { %v1269_v41 = vpop.f32.mrf.mxu1  ;;  %3363 = vmatprep.subr.bf16.mxu0 %v4596_v35  ;;  %v4641_v33 = vld [vmem:[%s6496_s5 + $0x14c] ss:$40 sps:$4 sm:$0xff]   ;;  %v4639_v35 = vld [vmem:[%s6496_s5 + $0x148] ss:$40 sps:$4 sm:$0xff]   ;;  %v4645_v39 = vld [vmem:[%s6496_s5 + $0xf8] ss:$40 sps:$4 sm:$0xff]  }
 0x1fe   : > { %v1311_v44 = vadd.f32 %v1310_v37, %v1268_v40  ;;  %v1270_v45 = vadd.f32 %v1269_v41, %v658_v29  ;;  %v1318_v52 = vmax.f32 %v1309_v43, 0.0  ;;  %v4635_v29 = vld [vmem:[%s6496_s5 + $0x19c] ss:$40 sps:$4 sm:$0xff]   ;;  %v4642_v36 = vld [vmem:[%s6496_s5 + $0x150] ss:$40 sps:$4 sm:$0xff]  }
 0x1ff   : > { %v4647_v37 = vld [vmem:[%s6496_s5 + $0xfc] ss:$40 sps:$4 sm:$0xff]   ;;  %v4648_v40 = vld [vmem:[%s6496_s5 + $0x100] ss:$40 sps:$4 sm:$0xff]   ;;  %v4654_v43 = vld [vmem:[%s6496_s5 + $0xb0] ss:$40 sps:$4 sm:$0xff]  }
 0x200   : > { %v1321_v48 = vmax.f32 %v1311_v44, 0.0  ;;  %v1313_v49 = vadd.f32 %v1312_v46, %v1270_v45  ;;  %3364 = vmatpush2.bf16.msra.mxu0 %v4594_v26  ;;  %v4650_v38 = vld [vmem:[%s6496_s5 + $0x104] ss:$40 sps:$4 sm:$0xff]   ;;  %v4656_v41 = vld [vmem:[%s6496_s5 + $0xb4] ss:$40 sps:$4 sm:$0xff]  }
 0x201   : > { %3365 = vmatprep.subr.bf16.mxu0 %v4602_v42  ;;  %v4653_v26 = vld [vmem:[%s6496_s5 + $0xac] ss:$40 sps:$4 sm:$0xff]   ;;  %v4651_v42 = vld [vmem:[%s6496_s5 + $0xa8] ss:$40 sps:$4 sm:$0xff]   ;;  %v4659_v44 = vld [vmem:[%s6496_s5 + $0x5c] ss:$40 sps:$4 sm:$0xff]  }
 0x202   : > { %v1337_v53 = vadd.f32 %v1321_v48, %v1317_v47  ;;  %v1322_v54 = vmax.f32 %v1313_v49, 0.0  ;;  %v4662_v45 = vld [vmem:[%s6496_s5 + $0x64] ss:$40 sps:$4 sm:$0xff]   ;;  %v4657_v46 = vld [vmem:[%s6496_s5 + $0x58] ss:$40 sps:$4 sm:$0xff]  }
 0x203   : > { %v4660_v47 = vld [vmem:[%s6496_s5 + $0x60] ss:$40 sps:$4 sm:$0xff]   ;;  %v4665_v48 = vld [vmem:[%s6496_s5 + $0xc] ss:$40 sps:$4 sm:$0xff]  }
 0x204   : > { %v1338_v55 = vrot.slane %v1337_v53, 4  ;;  %v1344_v5 = vadd.f32 %v1322_v54, %v1318_v52  ;;  %3366 = vmatpush2.bf16.msra.mxu0 %v4600_v50  ;;  %v4668_v49 = vld [vmem:[%s6496_s5 + $0x14] ss:$40 sps:$4 sm:$0xff]   ;;  %v4663_v50 = vld [vmem:[%s6496_s5 + $0x8] ss:$40 sps:$4 sm:$0xff]  }
 0x205   : > { %3367 = vmatprep.subr.bf16.mxu0 %v4608_v51  ;;  %v4666_v51 = vld [vmem:[%s6496_s5 + $0x10] ss:$40 sps:$4 sm:$0xff]   ;;  %v4671_v52 = vld [vmem:[%s6496_s5 + $0x4bc] ss:$40 sps:$4 sm:$0xff]  }
 0x206   : > { %v1339_v58 = vadd.f32 %v1338_v55, %v1337_v53  ;;  %v1345_v59 = vrot.slane %v1344_v5, 4  ;;  %v4674_v53 = vld [vmem:[%s6496_s5 + $0x4c4] ss:$40 sps:$4 sm:$0xff]   ;;  %v4669_v54 = vld [vmem:[%s6496_s5 + $0x4b8] ss:$40 sps:$4 sm:$0xff]  }
 0x207   : > { %v4672_v55 = vld [vmem:[%s6496_s5 + $0x4c0] ss:$40 sps:$4 sm:$0xff]  }
 0x208   : > { %v1340_v60 = vrot.slane %v1339_v58, 2  ;;  %v1346_v61 = vadd.f32 %v1345_v59, %v1344_v5  ;;  %3368 = vmatpush2.bf16.msra.mxu0 %v4606_v56  ;;  %v4677_v5 = vld [vmem:[%s6496_s5 + $0x46c] ss:$40 sps:$4 sm:$0xff]   ;;  %v4683_v59 = vld [vmem:[%s6496_s5 + $0x41c] ss:$40 sps:$4 sm:$0xff]  }
 0x209   : > { %3369 = vmatprep.subr.bf16.mxu0 %v4614_v57  ;;  %v4680_v56 = vld [vmem:[%s6496_s5 + $0x474] ss:$40 sps:$4 sm:$0xff]   ;;  %v4675_v57 = vld [vmem:[%s6496_s5 + $0x468] ss:$40 sps:$4 sm:$0xff]  }
 0x20a   : > { %v1341_v0 = vadd.f32 %v1340_v60, %v1339_v58  ;;  %v1347_v2 = vrot.slane %v1346_v61, 2  ;;  %v4678_v58 = vld [vmem:[%s6496_s5 + $0x470] ss:$40 sps:$4 sm:$0xff]   ;;  %v4686_v60 = vld [vmem:[%s6496_s5 + $0x424] ss:$40 sps:$4 sm:$0xff]  }
 0x20c   : > { %v1342_v4 = vrot.slane %v1341_v0, 1  ;;  %v1348_v6 = vadd.f32 %v1347_v2, %v1346_v61  ;;  %3370 = vmatpush2.bf16.msra.mxu0 %v4612_v62  ;;  %v4681_v61 = vld [vmem:[%s6496_s5 + $0x418] ss:$40 sps:$4 sm:$0xff]   ;;  %v4687_v2 = vld [vmem:[%s6496_s5 + $0x3c8] ss:$40 sps:$4 sm:$0xff]  }
 0x20d   : > { %3371 = vmatprep.subr.bf16.mxu0 %v4620_v63  ;;  %v4684_v62 = vld [vmem:[%s6496_s5 + $0x420] ss:$40 sps:$4 sm:$0xff]   ;;  %v4689_v63 = vld [vmem:[%s6496_s5 + $0x3cc] ss:$40 sps:$4 sm:$0xff]  }
 0x20e   : > { %v1343_v9 = vadd.f32 %v1342_v4, %v1341_v0  ;;  %v1349_v10 = vrot.slane %v1348_v6, 1  ;;  %v4692_v0 = vld [vmem:[%s6496_s5 + $0x3d4] ss:$40 sps:$4 sm:$0xff]   ;;  %v4690_v4 = vld [vmem:[%s6496_s5 + $0x3d0] ss:$40 sps:$4 sm:$0xff]  }
 0x210   : > { %v1350_v11 = vadd.f32 %v1349_v10, %v1348_v6  ;;  %3372 = vmatpush2.bf16.msra.mxu0 %v4618_v7  ;;  %v1354_v12 = vmul.f32 0.0625, %v1343_v9  ;;  %v4695_v6 = vld [vmem:[%s6496_s5 + $0x37c] ss:$40 sps:$4 sm:$0xff]   ;;  %v4696_v9 = vld [vmem:[%s6496_s5 + $0x380] ss:$40 sps:$4 sm:$0xff]  }
 0x211   : > { %3382 = vmatprep.subr.bf16.mxu0 %v4626_v8  ;;  %v4698_v7 = vld [vmem:[%s6496_s5 + $0x384] ss:$40 sps:$4 sm:$0xff]   ;;  %v4693_v8 = vld [vmem:[%s6496_s5 + $0x378] ss:$40 sps:$4 sm:$0xff]  }
 0x212   : > { %v1355_v13 = vmul.f32 0.0625, %v1350_v11  ;;  %v5759_v18 = vpack.c.bf16 %v1354_v12, %v1354_v12  ;;  %v4701_v10 = vld [vmem:[%s6496_s5 + $0x32c] ss:$40 sps:$4 sm:$0xff]   ;;  %v4699_v12 = vld [vmem:[%s6496_s5 + $0x328] ss:$40 sps:$4 sm:$0xff]  }
 0x213   : > { %v4704_v11 = vld [vmem:[%s6496_s5 + $0x334] ss:$40 sps:$4 sm:$0xff]  }
 0x214   : > { %v5751_v14 = vpack.c.bf16 %v1355_v13, %v1355_v13  ;;  %v4702_v13 = vld [vmem:[%s6496_s5 + $0x330] ss:$40 sps:$4 sm:$0xff]  }
 0x216   : > { %4252 = vmatprep.mubr.msk.bf16.mxu1 %vm3214_vm1, %v5751_v14  ;;  %4253 = vmatprep.mubr.msk.bf16.mxu0 %vm3214_vm1, %v5751_v14 }
 0x217   : > { %3292 = vmatmul.mubr.bf16.vlgmr.msra.gmra.mxu1 %v5759_v18  ;;  %3374 = vmatmul.mubr.bf16.vlgmr.msra.gmra.mxu0 %v5759_v18 }
 0x218   : > { %3301 = vmatpush1.bf16.msra.mxu1 %v4621_v15  ;;  %3383 = vmatpush1.bf16.msra.mxu0 %v4624_v16  ;;  %v4707_v15 = vld [vmem:[%s6496_s5 + $0x2dc] ss:$40 sps:$4 sm:$0xff]  }
 0x219   : > { %3332 = vmatprep.mubr.bf16.mxu1 %v5653_v1  ;;  %3414 = vmatprep.mubr.bf16.mxu0 %v5653_v1  ;;  %v4710_v16 = vld [vmem:[%s6496_s5 + $0x2e4] ss:$40 sps:$4 sm:$0xff]  }
 0x21a   : > { %3302 = vmatprep.subr.bf16.mxu1 %v4629_v20  ;;  %3384 = vmatprep.subr.bf16.mxu0 %v4632_v21  ;;  %v4705_v20 = vld [vmem:[%s6496_s5 + $0x2d8] ss:$40 sps:$4 sm:$0xff]  }
 0x21b   : > { %v4708_v21 = vld [vmem:[%s6496_s5 + $0x2e0] ss:$40 sps:$4 sm:$0xff]  }
 0x21c   : > { %3303 = vmatpush1.bf16.msra.mxu1 %v4627_v22  ;;  %3385 = vmatpush1.bf16.msra.mxu0 %v4630_v28  ;;  %v4713_v22 = vld [vmem:[%s6496_s5 + $0x28c] ss:$40 sps:$4 sm:$0xff]  }
 0x21d   : > { %3304 = vmatprep.subr.bf16.mxu1 %v4635_v29  ;;  %3386 = vmatprep.subr.bf16.mxu0 %v4638_v30  ;;  %v4716_v28 = vld [vmem:[%s6496_s5 + $0x294] ss:$40 sps:$4 sm:$0xff]   ;;  %v4711_v29 = vld [vmem:[%s6496_s5 + $0x288] ss:$40 sps:$4 sm:$0xff]  }
 0x21e   : > { %v4714_v30 = vld [vmem:[%s6496_s5 + $0x290] ss:$40 sps:$4 sm:$0xff]  }
 0x220   : > { %3305 = vmatpush1.bf16.msra.mxu1 %v4633_v31  ;;  %3387 = vmatpush1.bf16.msra.mxu0 %v4636_v32  ;;  %v4719_v31 = vld [vmem:[%s6496_s5 + $0x744] ss:$40 sps:$4 sm:$0xff]  }
 0x221   : > { %3306 = vmatprep.subr.bf16.mxu1 %v4641_v33  ;;  %3388 = vmatprep.subr.bf16.mxu0 %v4644_v34  ;;  %v4722_v32 = vld [vmem:[%s6496_s5 + $0x74c] ss:$40 sps:$4 sm:$0xff]   ;;  %v4717_v33 = vld [vmem:[%s6496_s5 + $0x740] ss:$40 sps:$4 sm:$0xff]  }
 0x222   : > { %v4720_v34 = vld [vmem:[%s6496_s5 + $0x748] ss:$40 sps:$4 sm:$0xff]  }
 0x224   : > { %3307 = vmatpush1.bf16.msra.mxu1 %v4639_v35  ;;  %3389 = vmatpush1.bf16.msra.mxu0 %v4642_v36  ;;  %v4725_v35 = vld [vmem:[%s6496_s5 + $0x6f4] ss:$40 sps:$4 sm:$0xff]  }
 0x225   : > { %3308 = vmatprep.subr.bf16.mxu1 %v4647_v37  ;;  %3390 = vmatprep.subr.bf16.mxu0 %v4650_v38  ;;  %v4728_v36 = vld [vmem:[%s6496_s5 + $0x6fc] ss:$40 sps:$4 sm:$0xff]   ;;  %v4723_v37 = vld [vmem:[%s6496_s5 + $0x6f0] ss:$40 sps:$4 sm:$0xff]  }
 0x226   : > { %v4726_v38 = vld [vmem:[%s6496_s5 + $0x6f8] ss:$40 sps:$4 sm:$0xff]  }
 0x228   : > { %3309 = vmatpush1.bf16.msra.mxu1 %v4645_v39  ;;  %3391 = vmatpush1.bf16.msra.mxu0 %v4648_v40  ;;  %v4731_v39 = vld [vmem:[%s6496_s5 + $0x6a4] ss:$40 sps:$4 sm:$0xff]  }
 0x229   : > { %3310 = vmatprep.subr.bf16.mxu1 %v4653_v26  ;;  %3392 = vmatprep.subr.bf16.mxu0 %v4656_v41  ;;  %v4734_v40 = vld [vmem:[%s6496_s5 + $0x6ac] ss:$40 sps:$4 sm:$0xff]   ;;  %v4729_v26 = vld [vmem:[%s6496_s5 + $0x6a0] ss:$40 sps:$4 sm:$0xff]  }
 0x22a   : > { %v4732_v41 = vld [vmem:[%s6496_s5 + $0x6a8] ss:$40 sps:$4 sm:$0xff]  }
 0x22c   : > { %3311 = vmatpush1.bf16.msra.mxu1 %v4651_v42  ;;  %3393 = vmatpush1.bf16.msra.mxu0 %v4654_v43  ;;  %v4737_v42 = vld [vmem:[%s6496_s5 + $0x654] ss:$40 sps:$4 sm:$0xff]  }
 0x22d   : > { %3312 = vmatprep.subr.bf16.mxu1 %v4659_v44  ;;  %3394 = vmatprep.subr.bf16.mxu0 %v4662_v45  ;;  %v4740_v43 = vld [vmem:[%s6496_s5 + $0x65c] ss:$40 sps:$4 sm:$0xff]   ;;  %v4735_v44 = vld [vmem:[%s6496_s5 + $0x650] ss:$40 sps:$4 sm:$0xff]  }
 0x22e   : > { %v4738_v45 = vld [vmem:[%s6496_s5 + $0x658] ss:$40 sps:$4 sm:$0xff]  }
 0x230   : > { %3313 = vmatpush1.bf16.msra.mxu1 %v4657_v46  ;;  %3395 = vmatpush1.bf16.msra.mxu0 %v4660_v47  ;;  %v4743_v46 = vld [vmem:[%s6496_s5 + $0x604] ss:$40 sps:$4 sm:$0xff]  }
 0x231   : > { %3314 = vmatprep.subr.bf16.mxu1 %v4665_v48  ;;  %3396 = vmatprep.subr.bf16.mxu0 %v4668_v49  ;;  %v4746_v47 = vld [vmem:[%s6496_s5 + $0x60c] ss:$40 sps:$4 sm:$0xff]   ;;  %v4741_v48 = vld [vmem:[%s6496_s5 + $0x600] ss:$40 sps:$4 sm:$0xff]  }
 0x232   : > { %v4744_v49 = vld [vmem:[%s6496_s5 + $0x608] ss:$40 sps:$4 sm:$0xff]  }
 0x234   : > { %3315 = vmatpush1.bf16.msra.mxu1 %v4663_v50  ;;  %3397 = vmatpush1.bf16.msra.mxu0 %v4666_v51  ;;  %v4749_v50 = vld [vmem:[%s6496_s5 + $0x5b4] ss:$40 sps:$4 sm:$0xff]  }
 0x235   : > { %3316 = vmatprep.subr.bf16.mxu1 %v4671_v52  ;;  %3398 = vmatprep.subr.bf16.mxu0 %v4674_v53  ;;  %v4752_v51 = vld [vmem:[%s6496_s5 + $0x5bc] ss:$40 sps:$4 sm:$0xff]   ;;  %v4747_v52 = vld [vmem:[%s6496_s5 + $0x5b0] ss:$40 sps:$4 sm:$0xff]  }
 0x236   : > { %v4750_v53 = vld [vmem:[%s6496_s5 + $0x5b8] ss:$40 sps:$4 sm:$0xff]  }
 0x238   : > { %3317 = vmatpush2.bf16.msra.mxu1 %v4669_v54  ;;  %3399 = vmatpush2.bf16.msra.mxu0 %v4672_v55  ;;  %v4755_v54 = vld [vmem:[%s6496_s5 + $0x564] ss:$40 sps:$4 sm:$0xff]  }
 0x239   : > { %3318 = vmatprep.subr.bf16.mxu1 %v4677_v5  ;;  %3400 = vmatprep.subr.bf16.mxu0 %v4680_v56  ;;  %v4758_v55 = vld [vmem:[%s6496_s5 + $0x56c] ss:$40 sps:$4 sm:$0xff]   ;;  %v4753_v5 = vld [vmem:[%s6496_s5 + $0x560] ss:$40 sps:$4 sm:$0xff]  }
 0x23a   : > { %v4756_v56 = vld [vmem:[%s6496_s5 + $0x568] ss:$40 sps:$4 sm:$0xff]  }
 0x23c   : > { %3319 = vmatpush2.bf16.msra.mxu1 %v4675_v57  ;;  %3401 = vmatpush2.bf16.msra.mxu0 %v4678_v58  ;;  %v4761_v57 = vld [vmem:[%s6496_s5 + $0x514] ss:$40 sps:$4 sm:$0xff]  }
 0x23d   : > { %3320 = vmatprep.subr.bf16.mxu1 %v4683_v59  ;;  %3402 = vmatprep.subr.bf16.mxu0 %v4686_v60  ;;  %v4764_v58 = vld [vmem:[%s6496_s5 + $0x51c] ss:$40 sps:$4 sm:$0xff]   ;;  %v4759_v59 = vld [vmem:[%s6496_s5 + $0x510] ss:$40 sps:$4 sm:$0xff]  }
 0x23e   : > { %v4762_v60 = vld [vmem:[%s6496_s5 + $0x518] ss:$40 sps:$4 sm:$0xff]  }
 0x240   : > { %3321 = vmatpush2.bf16.msra.mxu1 %v4681_v61  ;;  %3403 = vmatpush2.bf16.msra.mxu0 %v4684_v62  ;;  %v4767_v61 = vld [vmem:[%s6496_s5 + $0x924] ss:$40 sps:$4 sm:$0xff]  }
 0x241   : > { %3322 = vmatprep.subr.bf16.mxu1 %v4689_v63  ;;  %3404 = vmatprep.subr.bf16.mxu0 %v4692_v0  ;;  %v4770_v62 = vld [vmem:[%s6496_s5 + $0x92c] ss:$40 sps:$4 sm:$0xff]   ;;  %v4765_v63 = vld [vmem:[%s6496_s5 + $0x920] ss:$40 sps:$4 sm:$0xff]  }
 0x242   : > { %v4768_v0 = vld [vmem:[%s6496_s5 + $0x928] ss:$40 sps:$4 sm:$0xff]  }
 0x244   : > { %3323 = vmatpush2.bf16.msra.mxu1 %v4687_v2  ;;  %3405 = vmatpush2.bf16.msra.mxu0 %v4690_v4  ;;  %v4773_v2 = vld [vmem:[%s6496_s5 + $0x8d4] ss:$40 sps:$4 sm:$0xff]  }
 0x245   : > { %3324 = vmatprep.subr.bf16.mxu1 %v4695_v6  ;;  %3406 = vmatprep.subr.bf16.mxu0 %v4698_v7  ;;  %v4776_v4 = vld [vmem:[%s6496_s5 + $0x8dc] ss:$40 sps:$4 sm:$0xff]   ;;  %v4771_v6 = vld [vmem:[%s6496_s5 + $0x8d0] ss:$40 sps:$4 sm:$0xff]  }
 0x246   : > { %v4774_v7 = vld [vmem:[%s6496_s5 + $0x8d8] ss:$40 sps:$4 sm:$0xff]  }
 0x248   : > { %3325 = vmatpush2.bf16.msra.mxu1 %v4693_v8  ;;  %3407 = vmatpush2.bf16.msra.mxu0 %v4696_v9  ;;  %v4779_v8 = vld [vmem:[%s6496_s5 + $0x884] ss:$40 sps:$4 sm:$0xff]  }
 0x249   : > { %3326 = vmatprep.subr.bf16.mxu1 %v4701_v10  ;;  %3408 = vmatprep.subr.bf16.mxu0 %v4704_v11  ;;  %v4782_v9 = vld [vmem:[%s6496_s5 + $0x88c] ss:$40 sps:$4 sm:$0xff]   ;;  %v4777_v10 = vld [vmem:[%s6496_s5 + $0x880] ss:$40 sps:$4 sm:$0xff]  }
 0x24a   : > { %v4780_v11 = vld [vmem:[%s6496_s5 + $0x888] ss:$40 sps:$4 sm:$0xff]  }
 0x24c   : > { %3327 = vmatpush2.bf16.msra.mxu1 %v4699_v12  ;;  %3409 = vmatpush2.bf16.msra.mxu0 %v4702_v13  ;;  %v4785_v12 = vld [vmem:[%s6496_s5 + $0x834] ss:$40 sps:$4 sm:$0xff]  }
 0x24d   : > { %3328 = vmatprep.subr.bf16.mxu1 %v4707_v15  ;;  %3410 = vmatprep.subr.bf16.mxu0 %v4710_v16  ;;  %v4788_v13 = vld [vmem:[%s6496_s5 + $0x83c] ss:$40 sps:$4 sm:$0xff]   ;;  %v4783_v15 = vld [vmem:[%s6496_s5 + $0x830] ss:$40 sps:$4 sm:$0xff]  }
 0x24e   : > { %v4786_v16 = vld [vmem:[%s6496_s5 + $0x838] ss:$40 sps:$4 sm:$0xff]  }
 0x250   : > { %3329 = vmatpush2.bf16.msra.mxu1 %v4705_v20  ;;  %3411 = vmatpush2.bf16.msra.mxu0 %v4708_v21  ;;  %v4791_v20 = vld [vmem:[%s6496_s5 + $0x7e4] ss:$40 sps:$4 sm:$0xff]  }
 0x251   : > { %3330 = vmatprep.subr.bf16.mxu1 %v4713_v22  ;;  %3412 = vmatprep.subr.bf16.mxu0 %v4716_v28  ;;  %v4794_v21 = vld [vmem:[%s6496_s5 + $0x7ec] ss:$40 sps:$4 sm:$0xff]   ;;  %v4789_v22 = vld [vmem:[%s6496_s5 + $0x7e0] ss:$40 sps:$4 sm:$0xff]  }
 0x252   : > { %v4792_v28 = vld [vmem:[%s6496_s5 + $0x7e8] ss:$40 sps:$4 sm:$0xff]  }
 0x254   : > { %3331 = vmatpush2.bf16.msra.mxu1 %v4711_v29  ;;  %3413 = vmatpush2.bf16.msra.mxu0 %v4714_v30  ;;  %v4797_v29 = vld [vmem:[%s6496_s5 + $0x794] ss:$40 sps:$4 sm:$0xff]  }
 0x255   : > { %3423 = vmatprep.subr.bf16.mxu1 %v4719_v31  ;;  %3505 = vmatprep.subr.bf16.mxu0 %v4722_v32  ;;  %v4800_v30 = vld [vmem:[%s6496_s5 + $0x79c] ss:$40 sps:$4 sm:$0xff]   ;;  %v4795_v31 = vld [vmem:[%s6496_s5 + $0x790] ss:$40 sps:$4 sm:$0xff]  }
 0x256   : > { %v4798_v32 = vld [vmem:[%s6496_s5 + $0x798] ss:$40 sps:$4 sm:$0xff]  }
 0x257   : > { %3333 = vmatmul.mubr.bf16.vlgmr.msra.gmra.mxu1 %v5658_v3  ;;  %3415 = vmatmul.mubr.bf16.vlgmr.msra.gmra.mxu0 %v5658_v3 }
 0x258   : > { %3424 = vmatpush1.bf16.msra.mxu1 %v4717_v33  ;;  %4254 = vmatprep.mubr.msk.bf16.mxu1 %vm3214_vm1, %v5751_v14  ;;  %v4803_v33 = vld [vmem:[%s6496_s5 + $0x24c] ss:$40 sps:$4 sm:$0xff]  }
 0x259   : > { %3506 = vmatpush1.bf16.msra.mxu0 %v4720_v34  ;;  %4255 = vmatprep.mubr.msk.bf16.mxu0 %vm3214_vm1, %v5751_v14  ;;  %v4806_v34 = vld [vmem:[%s6496_s5 + $0x254] ss:$40 sps:$4 sm:$0xff]  }
 0x25a   : > { %3425 = vmatprep.subr.bf16.mxu1 %v4725_v35  ;;  %3507 = vmatprep.subr.bf16.mxu0 %v4728_v36  ;;  %v4801_v35 = vld [vmem:[%s6496_s5 + $0x248] ss:$40 sps:$4 sm:$0xff]  }
 0x25b   : > { %v4804_v36 = vld [vmem:[%s6496_s5 + $0x250] ss:$40 sps:$4 sm:$0xff]  }
 0x25c   : > { %3426 = vmatpush1.bf16.msra.mxu1 %v4723_v37  ;;  %v4809_v37 = vld [vmem:[%s6496_s5 + $0x1fc] ss:$40 sps:$4 sm:$0xff]  }
 0x25d   : > { %3508 = vmatpush1.bf16.msra.mxu0 %v4726_v38  ;;  %3427 = vmatprep.subr.bf16.mxu1 %v4731_v39  ;;  %v4812_v38 = vld [vmem:[%s6496_s5 + $0x204] ss:$40 sps:$4 sm:$0xff]   ;;  %v4807_v39 = vld [vmem:[%s6496_s5 + $0x1f8] ss:$40 sps:$4 sm:$0xff]  }
 0x25e   : > { %3509 = vmatprep.subr.bf16.mxu0 %v4734_v40  ;;  %v4810_v40 = vld [vmem:[%s6496_s5 + $0x200] ss:$40 sps:$4 sm:$0xff]  }
 0x260   : > { %3428 = vmatpush1.bf16.msra.mxu1 %v4729_v26  ;;  %v4815_v26 = vld [vmem:[%s6496_s5 + $0x1ac] ss:$40 sps:$4 sm:$0xff]  }
 0x261   : > { %3510 = vmatpush1.bf16.msra.mxu0 %v4732_v41  ;;  %3429 = vmatprep.subr.bf16.mxu1 %v4737_v42  ;;  %v4818_v41 = vld [vmem:[%s6496_s5 + $0x1b4] ss:$40 sps:$4 sm:$0xff]   ;;  %v4813_v42 = vld [vmem:[%s6496_s5 + $0x1a8] ss:$40 sps:$4 sm:$0xff]  }
 0x262   : > { %3511 = vmatprep.subr.bf16.mxu0 %v4740_v43  ;;  %v4816_v43 = vld [vmem:[%s6496_s5 + $0x1b0] ss:$40 sps:$4 sm:$0xff]  }
 0x264   : > { %3430 = vmatpush1.bf16.msra.mxu1 %v4735_v44  ;;  %v4824_v44 = vld [vmem:[%s6496_s5 + $0x164] ss:$40 sps:$4 sm:$0xff]  }
 0x265   : > { %3512 = vmatpush1.bf16.msra.mxu0 %v4738_v45  ;;  %3431 = vmatprep.subr.bf16.mxu1 %v4743_v46  ;;  %v4819_v45 = vld [vmem:[%s6496_s5 + $0x158] ss:$40 sps:$4 sm:$0xff]  }
 0x266   : > { %3513 = vmatprep.subr.bf16.mxu0 %v4746_v47  ;;  %v4822_v46 = vld [vmem:[%s6496_s5 + $0x160] ss:$40 sps:$4 sm:$0xff]   ;;  %v4827_v47 = vld [vmem:[%s6496_s5 + $0x10c] ss:$40 sps:$4 sm:$0xff]  }
 0x268   : > { %3432 = vmatpush1.bf16.msra.mxu1 %v4741_v48  ;;  %v4830_v48 = vld [vmem:[%s6496_s5 + $0x114] ss:$40 sps:$4 sm:$0xff]  }
 0x269   : > { %3514 = vmatpush1.bf16.msra.mxu0 %v4744_v49  ;;  %3433 = vmatprep.subr.bf16.mxu1 %v4749_v50  ;;  %v4825_v50 = vld [vmem:[%s6496_s5 + $0x108] ss:$40 sps:$4 sm:$0xff]  }
 0x26a   : > { %3515 = vmatprep.subr.bf16.mxu0 %v4752_v51 }
 0x26c   : > { %3434 = vmatpush1.bf16.msra.mxu1 %v4747_v52  ;;  %v4828_v52 = vld [vmem:[%s6496_s5 + $0x110] ss:$40 sps:$4 sm:$0xff]  }
 0x26d   : > { %3516 = vmatpush1.bf16.msra.mxu0 %v4750_v53  ;;  %3435 = vmatprep.subr.bf16.mxu1 %v4755_v54  ;;  %v4833_v53 = vld [vmem:[%s6496_s5 + $0xbc] ss:$40 sps:$4 sm:$0xff]  }
 0x26e   : > { %3517 = vmatprep.subr.bf16.mxu0 %v4758_v55  ;;  %v4836_v54 = vld [vmem:[%s6496_s5 + $0xc4] ss:$40 sps:$4 sm:$0xff]  }
 0x270   : > { %3436 = vmatpush1.bf16.msra.mxu1 %v4753_v5  ;;  %v4831_v5 = vld [vmem:[%s6496_s5 + $0xb8] ss:$40 sps:$4 sm:$0xff]  }
 0x271   : > { %3518 = vmatpush1.bf16.msra.mxu0 %v4756_v56  ;;  %3437 = vmatprep.subr.bf16.mxu1 %v4761_v57  ;;  %v4834_v57 = vld [vmem:[%s6496_s5 + $0xc0] ss:$40 sps:$4 sm:$0xff]  }
 0x272   : > { %3519 = vmatprep.subr.bf16.mxu0 %v4764_v58  ;;  %v4839_v58 = vld [vmem:[%s6496_s5 + $0x6c] ss:$40 sps:$4 sm:$0xff]  }
 0x274   : > { %3438 = vmatpush1.bf16.msra.mxu1 %v4759_v59  ;;  %v4842_v59 = vld [vmem:[%s6496_s5 + $0x74] ss:$40 sps:$4 sm:$0xff]  }
 0x275   : > { %3520 = vmatpush1.bf16.msra.mxu0 %v4762_v60  ;;  %3443 = vmatprep.subr.bf16.mxu1 %v4767_v61  ;;  %v4837_v60 = vld [vmem:[%s6496_s5 + $0x68] ss:$40 sps:$4 sm:$0xff]  }
 0x276   : > { %3525 = vmatprep.subr.bf16.mxu0 %v4770_v62  ;;  %v4840_v61 = vld [vmem:[%s6496_s5 + $0x70] ss:$40 sps:$4 sm:$0xff]   ;;  %v4845_v62 = vld [vmem:[%s6496_s5 + $0x1c] ss:$40 sps:$4 sm:$0xff]  }
 0x278   : > { %3444 = vmatpush2.bf16.msra.mxu1 %v4765_v63  ;;  %v4848_v63 = vld [vmem:[%s6496_s5 + $0x24] ss:$40 sps:$4 sm:$0xff]  }
 0x279   : > { %3526 = vmatpush2.bf16.msra.mxu0 %v4768_v0  ;;  %3445 = vmatprep.subr.bf16.mxu1 %v4773_v2  ;;  %v4843_v0 = vld [vmem:[%s6496_s5 + $0x18] ss:$40 sps:$4 sm:$0xff]  }
 0x27a   : > { %3527 = vmatprep.subr.bf16.mxu0 %v4776_v4  ;;  %v4846_v2 = vld [vmem:[%s6496_s5 + $0x20] ss:$40 sps:$4 sm:$0xff]   ;;  %v4851_v4 = vld [vmem:[%s6496_s5 + $0x4cc] ss:$40 sps:$4 sm:$0xff]  }
 0x27c   : > { %3446 = vmatpush2.bf16.msra.mxu1 %v4771_v6  ;;  %v4854_v6 = vld [vmem:[%s6496_s5 + $0x4d4] ss:$40 sps:$4 sm:$0xff]  }
 0x27d   : > { %3528 = vmatpush2.bf16.msra.mxu0 %v4774_v7  ;;  %3447 = vmatprep.subr.bf16.mxu1 %v4779_v8  ;;  %v4849_v7 = vld [vmem:[%s6496_s5 + $0x4c8] ss:$40 sps:$4 sm:$0xff]  }
 0x27e   : > { %3529 = vmatprep.subr.bf16.mxu0 %v4782_v9  ;;  %v4852_v8 = vld [vmem:[%s6496_s5 + $0x4d0] ss:$40 sps:$4 sm:$0xff]   ;;  %v4857_v9 = vld [vmem:[%s6496_s5 + $0x47c] ss:$40 sps:$4 sm:$0xff]  }
 0x280   : > { %3448 = vmatpush2.bf16.msra.mxu1 %v4777_v10  ;;  %v4860_v10 = vld [vmem:[%s6496_s5 + $0x484] ss:$40 sps:$4 sm:$0xff]  }
 0x281   : > { %3530 = vmatpush2.bf16.msra.mxu0 %v4780_v11  ;;  %3449 = vmatprep.subr.bf16.mxu1 %v4785_v12  ;;  %v4855_v11 = vld [vmem:[%s6496_s5 + $0x478] ss:$40 sps:$4 sm:$0xff]  }
 0x282   : > { %3531 = vmatprep.subr.bf16.mxu0 %v4788_v13  ;;  %v4858_v12 = vld [vmem:[%s6496_s5 + $0x480] ss:$40 sps:$4 sm:$0xff]   ;;  %v4863_v13 = vld [vmem:[%s6496_s5 + $0x42c] ss:$40 sps:$4 sm:$0xff]  }
 0x284   : > { %3450 = vmatpush2.bf16.msra.mxu1 %v4783_v15  ;;  %v4866_v15 = vld [vmem:[%s6496_s5 + $0x434] ss:$40 sps:$4 sm:$0xff]  }
 0x285   : > { %3532 = vmatpush2.bf16.msra.mxu0 %v4786_v16  ;;  %3451 = vmatprep.subr.bf16.mxu1 %v4791_v20  ;;  %v4861_v16 = vld [vmem:[%s6496_s5 + $0x428] ss:$40 sps:$4 sm:$0xff]  }
 0x286   : > { %3533 = vmatprep.subr.bf16.mxu0 %v4794_v21  ;;  %v4864_v20 = vld [vmem:[%s6496_s5 + $0x430] ss:$40 sps:$4 sm:$0xff]   ;;  %v4869_v21 = vld [vmem:[%s6496_s5 + $0x3dc] ss:$40 sps:$4 sm:$0xff]  }
 0x288   : > { %3452 = vmatpush2.bf16.msra.mxu1 %v4789_v22  ;;  %v4872_v22 = vld [vmem:[%s6496_s5 + $0x3e4] ss:$40 sps:$4 sm:$0xff]  }
 0x289   : > { %3534 = vmatpush2.bf16.msra.mxu0 %v4792_v28  ;;  %3453 = vmatprep.subr.bf16.mxu1 %v4797_v29  ;;  %v4867_v28 = vld [vmem:[%s6496_s5 + $0x3d8] ss:$40 sps:$4 sm:$0xff]  }
 0x28a   : > { %3535 = vmatprep.subr.bf16.mxu0 %v4800_v30  ;;  %v4870_v29 = vld [vmem:[%s6496_s5 + $0x3e0] ss:$40 sps:$4 sm:$0xff]   ;;  %v4875_v30 = vld [vmem:[%s6496_s5 + $0x38c] ss:$40 sps:$4 sm:$0xff]  }
 0x28c   : > { %3454 = vmatpush2.bf16.msra.mxu1 %v4795_v31  ;;  %v4878_v31 = vld [vmem:[%s6496_s5 + $0x394] ss:$40 sps:$4 sm:$0xff]  }
 0x28d   : > { %3536 = vmatpush2.bf16.msra.mxu0 %v4798_v32  ;;  %3464 = vmatprep.subr.bf16.mxu1 %v4803_v33  ;;  %v4873_v32 = vld [vmem:[%s6496_s5 + $0x388] ss:$40 sps:$4 sm:$0xff]  }
 0x28e   : > { %3546 = vmatprep.subr.bf16.mxu0 %v4806_v34  ;;  %v4876_v33 = vld [vmem:[%s6496_s5 + $0x390] ss:$40 sps:$4 sm:$0xff]   ;;  %v4881_v34 = vld [vmem:[%s6496_s5 + $0x33c] ss:$40 sps:$4 sm:$0xff]  }
 0x28f   : > { %3456 = vmatmul.mubr.bf16.vlgmr.msra.gmra.mxu1 %v5759_v18 }
 0x290   : > { %3538 = vmatmul.mubr.bf16.vlgmr.msra.gmra.mxu0 %v5759_v18  ;;  %3465 = vmatpush1.bf16.msra.mxu1 %v4801_v35  ;;  %v4884_v35 = vld [vmem:[%s6496_s5 + $0x344] ss:$40 sps:$4 sm:$0xff]  }
 0x291   : > { %3496 = vmatprep.mubr.bf16.mxu1 %v5653_v1  ;;  %3547 = vmatpush1.bf16.msra.mxu0 %v4804_v36  ;;  %v4879_v36 = vld [vmem:[%s6496_s5 + $0x338] ss:$40 sps:$4 sm:$0xff]  }
 0x292   : > { %3578 = vmatprep.mubr.bf16.mxu0 %v5653_v1  ;;  %3466 = vmatprep.subr.bf16.mxu1 %v4809_v37  ;;  %v4821_v1 = vld [vmem:[%s6496_s5 + $0x15c] ss:$40 sps:$4 sm:$0xff]   ;;  %v4882_v37 = vld [vmem:[%s6496_s5 + $0x340] ss:$40 sps:$4 sm:$0xff]  }
 0x293   : > { %3548 = vmatprep.subr.bf16.mxu0 %v4812_v38  ;;  %v4887_v38 = vld [vmem:[%s6496_s5 + $0x2ec] ss:$40 sps:$4 sm:$0xff]  }
 0x294   : > { %3467 = vmatpush1.bf16.msra.mxu1 %v4807_v39  ;;  %v4890_v39 = vld [vmem:[%s6496_s5 + $0x2f4] ss:$40 sps:$4 sm:$0xff]  }
 0x295   : > { %3549 = vmatpush1.bf16.msra.mxu0 %v4810_v40  ;;  %3468 = vmatprep.subr.bf16.mxu1 %v4815_v26  ;;  %v4885_v40 = vld [vmem:[%s6496_s5 + $0x2e8] ss:$40 sps:$4 sm:$0xff]  }
 0x296   : > { %3550 = vmatprep.subr.bf16.mxu0 %v4818_v41  ;;  %v4888_v26 = vld [vmem:[%s6496_s5 + $0x2f0] ss:$40 sps:$4 sm:$0xff]   ;;  %v4893_v41 = vld [vmem:[%s6496_s5 + $0x29c] ss:$40 sps:$4 sm:$0xff]  }
 0x298   : > { %3469 = vmatpush1.bf16.msra.mxu1 %v4813_v42  ;;  %v4896_v42 = vld [vmem:[%s6496_s5 + $0x2a4] ss:$40 sps:$4 sm:$0xff]  }
 0x299   : > { %3551 = vmatpush1.bf16.msra.mxu0 %v4816_v43  ;;  %3470 = vmatprep.subr.bf16.mxu1 %v4821_v1  ;;  %v4891_v43 = vld [vmem:[%s6496_s5 + $0x298] ss:$40 sps:$4 sm:$0xff]  }
 0x29a   : > { %3552 = vmatprep.subr.bf16.mxu0 %v4824_v44  ;;  %v4894_v1 = vld [vmem:[%s6496_s5 + $0x2a0] ss:$40 sps:$4 sm:$0xff]   ;;  %v4899_v44 = vld [vmem:[%s6496_s5 + $0x754] ss:$40 sps:$4 sm:$0xff]  }
 0x29b   : > { %v6181_v49 = vpop.f32.mrf.mxu0 }
 0x29c   : > { %3471 = vmatpush1.bf16.msra.mxu1 %v4819_v45  ;;  %v4897_v45 = vld [vmem:[%s6496_s5 + $0x750] ss:$40 sps:$4 sm:$0xff]  }
 0x29d   : > { %3553 = vmatpush1.bf16.msra.mxu0 %v4822_v46  ;;  %v6186_v51 = vpop.f32.mrf.mxu0  ;;  %3472 = vmatprep.subr.bf16.mxu1 %v4827_v47  ;;  %v4902_v46 = vld [vmem:[%s6496_s5 + $0x704] ss:$40 sps:$4 sm:$0xff]  }
 0x29e   : > { %3554 = vmatprep.subr.bf16.mxu0 %v4830_v48  ;;  %v6335_v47 = vld [vmem:[%s6497_s6] sm:$0xff] }
 0x29f   : > { %v3256_v55 = vpop.f32.mrf.mxu0  ;;  %v4900_v48 = vld [vmem:[%s6496_s5 + $0x700] ss:$40 sps:$4 sm:$0xff]  }
 0x2a0   : > { %3473 = vmatpush1.bf16.msra.mxu1 %v4825_v50  ;;  %v4905_v50 = vld [vmem:[%s6496_s5 + $0x6b4] ss:$40 sps:$4 sm:$0xff]  }
 0x2a1   : > { %3555 = vmatpush1.bf16.msra.mxu0 %v4828_v52  ;;  %v3257_v56 = vpop.f32.mrf.mxu0  ;;  %3474 = vmatprep.subr.bf16.mxu1 %v4833_v53  ;;  %v3167_v52 = vrot.slane %v6335_v47, %v5639_v25  ;;  %v3171_v53 = vrot.slane %v6335_v47, %v5647_v27 }
 0x2a2   : > { %3556 = vmatprep.subr.bf16.mxu0 %v4836_v54 }
 0x2a3   : > { %v3253_v54 = vadd.f32 %v6181_v49, %v3167_v52  ;;  %v3255_v56 = vadd.f32 %v6186_v51, %v3171_v53  ;;  %v4909_v51 = vld [vmem:[%s6496_s5 + $0x610] ss:$40 sps:$4 sm:$0xff]  }
 0x2a4   : > { %3475 = vmatpush1.bf16.msra.mxu1 %v4831_v5 }
 0x2a5   : > { %3557 = vmatpush1.bf16.msra.mxu0 %v4834_v57  ;;  %3476 = vmatprep.subr.bf16.mxu1 %v4839_v58  ;;  %v4906_v58 = vld [vmem:[%s6496_s5 + $0x660] ss:$40 sps:$4 sm:$0xff]  }
 0x2a6   : > { %3558 = vmatprep.subr.bf16.mxu0 %v4842_v59 }
 0x2a8   : > { %3477 = vmatpush1.bf16.msra.mxu1 %v4837_v60 }
 0x2a9   : > { %3559 = vmatpush1.bf16.msra.mxu0 %v4840_v61  ;;  %3478 = vmatprep.subr.bf16.mxu1 %v4845_v62  ;;  %v4911_v61 = vld [vmem:[%s6496_s5 + $0x614] ss:$40 sps:$4 sm:$0xff]  }
 0x2aa   : > { %3560 = vmatprep.subr.bf16.mxu0 %v4848_v63 }
 0x2ac   : > { %3479 = vmatpush1.bf16.msra.mxu1 %v4843_v0 }
 0x2ad   : > { %3561 = vmatpush1.bf16.msra.mxu0 %v4846_v2  ;;  %3480 = vmatprep.subr.bf16.mxu1 %v4851_v4  ;;  %v4914_v4 = vld [vmem:[%s6496_s5 + $0x5c4] ss:$40 sps:$4 sm:$0xff]  }
 0x2ae   : > { %3562 = vmatprep.subr.bf16.mxu0 %v4854_v6  ;;  %v4912_v6 = vld [vmem:[%s6496_s5 + $0x5c0] ss:$40 sps:$4 sm:$0xff]  }
 0x2b0   : > { %3481 = vmatpush2.bf16.msra.mxu1 %v4849_v7  ;;  %v4917_v7 = vld [vmem:[%s6496_s5 + $0x574] ss:$40 sps:$4 sm:$0xff]  }
 0x2b1   : > { %3563 = vmatpush2.bf16.msra.mxu0 %v4852_v8  ;;  %3482 = vmatprep.subr.bf16.mxu1 %v4857_v9  ;;  %v4915_v8 = vld [vmem:[%s6496_s5 + $0x570] ss:$40 sps:$4 sm:$0xff]   ;;  %v4920_v9 = vld [vmem:[%s6496_s5 + $0x524] ss:$40 sps:$4 sm:$0xff]  }
 0x2b2   : > { %3564 = vmatprep.subr.bf16.mxu0 %v4860_v10  ;;  %v4918_v10 = vld [vmem:[%s6496_s5 + $0x520] ss:$40 sps:$4 sm:$0xff]  }
 0x2b4   : > { %3483 = vmatpush2.bf16.msra.mxu1 %v4855_v11  ;;  %v4923_v11 = vld [vmem:[%s6496_s5 + $0x934] ss:$40 sps:$4 sm:$0xff]  }
 0x2b5   : > { %3565 = vmatpush2.bf16.msra.mxu0 %v4858_v12  ;;  %3484 = vmatprep.subr.bf16.mxu1 %v4863_v13  ;;  %v4921_v12 = vld [vmem:[%s6496_s5 + $0x930] ss:$40 sps:$4 sm:$0xff]   ;;  %v4926_v13 = vld [vmem:[%s6496_s5 + $0x8e4] ss:$40 sps:$4 sm:$0xff]  }
 0x2b6   : > { %3566 = vmatprep.subr.bf16.mxu0 %v4866_v15  ;;  %v4924_v15 = vld [vmem:[%s6496_s5 + $0x8e0] ss:$40 sps:$4 sm:$0xff]  }
 0x2b8   : > { %3485 = vmatpush2.bf16.msra.mxu1 %v4861_v16  ;;  %v4929_v16 = vld [vmem:[%s6496_s5 + $0x894] ss:$40 sps:$4 sm:$0xff]  }
 0x2b9   : > { %3567 = vmatpush2.bf16.msra.mxu0 %v4864_v20  ;;  %3486 = vmatprep.subr.bf16.mxu1 %v4869_v21  ;;  %v4927_v20 = vld [vmem:[%s6496_s5 + $0x890] ss:$40 sps:$4 sm:$0xff]   ;;  %v4932_v21 = vld [vmem:[%s6496_s5 + $0x844] ss:$40 sps:$4 sm:$0xff]  }
 0x2ba   : > { %3568 = vmatprep.subr.bf16.mxu0 %v4872_v22  ;;  %v4930_v22 = vld [vmem:[%s6496_s5 + $0x840] ss:$40 sps:$4 sm:$0xff]  }
 0x2bc   : > { %3487 = vmatpush2.bf16.msra.mxu1 %v4867_v28  ;;  %v4935_v28 = vld [vmem:[%s6496_s5 + $0x7f4] ss:$40 sps:$4 sm:$0xff]  }
 0x2bd   : > { %3569 = vmatpush2.bf16.msra.mxu0 %v4870_v29  ;;  %3488 = vmatprep.subr.bf16.mxu1 %v4875_v30  ;;  %v4933_v29 = vld [vmem:[%s6496_s5 + $0x7f0] ss:$40 sps:$4 sm:$0xff]   ;;  %v4938_v30 = vld [vmem:[%s6496_s5 + $0x7a4] ss:$40 sps:$4 sm:$0xff]  }
 0x2be   : > { %3570 = vmatprep.subr.bf16.mxu0 %v4878_v31  ;;  %v4936_v31 = vld [vmem:[%s6496_s5 + $0x7a0] ss:$40 sps:$4 sm:$0xff]  }
 0x2c0   : > { %3489 = vmatpush2.bf16.msra.mxu1 %v4873_v32  ;;  %v3179_v32 = vrot.slane %v6335_v47, %v657_v19  ;;  %v3182_v19 = vsub.s32 4, %v5636_v24 }
 0x2c1   : > { %3571 = vmatpush2.bf16.msra.mxu0 %v4876_v33  ;;  %3490 = vmatprep.subr.bf16.mxu1 %v4881_v34 }
 0x2c2   : > { %3572 = vmatprep.subr.bf16.mxu0 %v4884_v35 }
 0x2c4   : > { %3491 = vmatpush2.bf16.msra.mxu1 %v4879_v36 }
 0x2c5   : > { %3573 = vmatpush2.bf16.msra.mxu0 %v4882_v37  ;;  %3492 = vmatprep.subr.bf16.mxu1 %v4887_v38 }
 0x2c6   : > { %3574 = vmatprep.subr.bf16.mxu0 %v4890_v39 }
 0x2c8   : > { %3493 = vmatpush2.bf16.msra.mxu1 %v4885_v40 }
 0x2c9   : > { %3575 = vmatpush2.bf16.msra.mxu0 %v4888_v26  ;;  %3494 = vmatprep.subr.bf16.mxu1 %v4893_v41 }
 0x2ca   : > { %3576 = vmatprep.subr.bf16.mxu0 %v4896_v42 }
 0x2cc   : > { %3495 = vmatpush2.bf16.msra.mxu1 %v4891_v43  ;;  %v3183_v43 = vrot.slane %v6335_v47, %v3182_v19 }
 0x2cd   : > { %3577 = vmatpush2.bf16.msra.mxu0 %v4894_v1  ;;  %3587 = vmatprep.subr.bf16.mxu1 %v4899_v44 }
 0x2cf   : > { %3497 = vmatmul.mubr.bf16.vlgmr.msra.gmra.mxu1 %v5658_v3 }
 0x2d0   : > { %3579 = vmatmul.mubr.bf16.vlgmr.msra.gmra.mxu0 %v5658_v3  ;;  %3588 = vmatpush1.bf16.msra.mxu1 %v4897_v45  ;;  %v4903_v3 = vld [vmem:[%s6496_s5 + $0x6b0] ss:$40 sps:$4 sm:$0xff]  }
 0x2d1   : > { %4256 = vmatprep.mubr.msk.bf16.mxu1 %vm3214_vm1, %v5751_v14  ;;  %3589 = vmatprep.subr.bf16.mxu1 %v4902_v46  ;;  %v4908_v14 = vld [vmem:[%s6496_s5 + $0x664] ss:$40 sps:$4 sm:$0xff]  }
 0x2d4   : > { %3590 = vmatpush1.bf16.msra.mxu1 %v4900_v48 }
 0x2d5   : > { %3591 = vmatprep.subr.bf16.mxu1 %v4905_v50 }
 0x2d7   : > { %v3293_v55 = vpop.f32.mrf.mxu1  ;;  %v6358_v5 = vpop.f32.mrf.mxu0 }
 0x2d8   : > { %v6361_v57 = vadd.f32 %v3293_v55, %v3253_v54  ;;  %3592 = vmatpush1.bf16.msra.mxu1 %v4903_v3 }
 0x2d9   : > { %v3295_v59 = vpop.f32.mrf.mxu1  ;;  %v3377_v60 = vpop.f32.mrf.mxu0  ;;  %3593 = vmatprep.subr.bf16.mxu1 %v4908_v14 }
 0x2da   : > { %v6369_v49 = vadd.f32 %v3295_v59, %v3255_v56 }
 0x2db   : > { %v3297_v62 = vpop.f32.mrf.mxu1  ;;  %v3379_v63 = vpop.f32.mrf.mxu0 }
 0x2dc   : > { %3594 = vmatpush1.bf16.msra.mxu1 %v4906_v58 }
 0x2dd   : > { %v3298_v0 = vpop.f32.mrf.mxu1  ;;  %v3380_v2 = vpop.f32.mrf.mxu0  ;;  %3595 = vmatprep.subr.bf16.mxu1 %v4911_v61  ;;  %v3194_v61 = vsub.s32 7, %v5636_v24 }
 0x2df   : > { %v3195_v63 = vrot.slane %v6335_v47, %v3194_v61 }
 0x2e0   : > { %3596 = vmatpush1.bf16.msra.mxu1 %v4909_v51 }
 0x2e1   : > { %3597 = vmatprep.subr.bf16.mxu1 %v4914_v4 }
 0x2e4   : > { %3598 = vmatpush1.bf16.msra.mxu1 %v4912_v6 }
 0x2e5   : > { %3599 = vmatprep.subr.bf16.mxu1 %v4917_v7 }
 0x2e8   : > { %3600 = vmatpush1.bf16.msra.mxu1 %v4915_v8 }
 0x2e9   : > { %3601 = vmatprep.subr.bf16.mxu1 %v4920_v9 }
 0x2ec   : > { %3602 = vmatpush1.bf16.msra.mxu1 %v4918_v10 }
 0x2ed   : > { %3607 = vmatprep.subr.bf16.mxu1 %v4923_v11 }
 0x2f0   : > { %3608 = vmatpush2.bf16.msra.mxu1 %v4921_v12 }
 0x2f1   : > { %3609 = vmatprep.subr.bf16.mxu1 %v4926_v13 }
 0x2f4   : > { %3610 = vmatpush2.bf16.msra.mxu1 %v4924_v15 }
 0x2f5   : > { %3611 = vmatprep.subr.bf16.mxu1 %v4929_v16  ;;  %v4257_v16 = vmul.f32 -1.442695, %v6361_v57 }
 0x2f8   : > { %3612 = vmatpush2.bf16.msra.mxu1 %v4927_v20  ;;  %v4258_v20 = vmul.f32 -1.442695, %v6369_v49 }
 0x2f9   : > { %3613 = vmatprep.subr.bf16.mxu1 %v4932_v21 }
 0x2fc   : > { %3614 = vmatpush2.bf16.msra.mxu1 %v4930_v22  ;;  %v1661_v22 = vld [vmem:[%s6497_s6 + $0x8] sm:$0x3] }
 0x2fd   : > { %3615 = vmatprep.subr.bf16.mxu1 %v4935_v28 }
 0x300   : > { %3616 = vmatpush2.bf16.msra.mxu1 %v4933_v29 }
 0x301   : > { %3617 = vmatprep.subr.bf16.mxu1 %v4938_v30  ;;  %v3199_v30 = vrot.slane %v1661_v22, %v5639_v25 }
 0x304   : > { %3618 = vmatpush2.bf16.msra.mxu1 %v4936_v31 }
 0x307   : > { %3620 = vmatmul.mubr.bf16.vlgmr.msra.gmra.mxu1 %v5759_v18  ;;  %v3186_v18 = vsub.s32 5, %v5636_v24 }
 0x309   : > { %v3187_v1 = vrot.slane %v6335_v47, %v3186_v18 }
 0x317   : > { %v6432_v33 = vpop.f32.mrf.mxu1  ;;  %v3416_v34 = vpop.f32.mrf.mxu0 }
 0x318   : > { %v3417_v44 = vadd.f32 %v3416_v34, %v3183_v43 }
 0x319   : > { %v3336_v35 = vpop.f32.mrf.mxu1  ;;  %v3418_v36 = vpop.f32.mrf.mxu0 }
 0x31a   : > { %v3337_v37 = vadd.f32 %v3336_v35, %v3179_v32  ;;  %v3419_v46 = vadd.f32 %v3418_v36, %v3187_v1  ;;  %v3203_v32 = vrot.slane %v1661_v22, %v5647_v27  ;;  %v5000_v22 = vmov 1966171168  }
 0x31b   : > { %v3338_v38 = vpop.f32.mrf.mxu1  ;;  %v3420_v39 = vpop.f32.mrf.mxu0 }
 0x31c   : > { %v6434_v40 = vadd.f32 %v3377_v60, %v3337_v37  ;;  %v3190_v60 = vsub.s32 6, %v5636_v24 }
 0x31d   : > { %v3339_v26 = vpop.f32.mrf.mxu1  ;;  %v3421_v41 = vpop.f32.mrf.mxu0 }
 0x31e   : > { %4939 = vtanh.f32 %v6434_v40  ;;  %v3191_v62 = vrot.slane %v6335_v47, %v3190_v60 }
 0x32b   : > { %v4940_v42 = vpop.eup %4939 }
 0x32c   : > { %3684 = vrot.lane.b32.xlu0 %v4940_v42, %s4998_s17 }
 0x34f   : > { %v3457_v45 = vpop.f32.mrf.mxu1 }
 0x350   : > { %v3458_v48 = vadd.f32 %v3457_v45, %v3417_v44  ;;  %v3539_v50 = vpop.f32.mrf.mxu0  ;;  %v3175_v45 = vrot.slane %v6335_v47, %v653_v17 }
 0x351   : > { %v3459_v52 = vpop.f32.mrf.mxu1 }
 0x352   : > { %4941 = vtanh.f32 %v3458_v48  ;;  %v3460_v53 = vadd.f32 %v3459_v52, %v3419_v46  ;;  %v3541_v3 = vpop.f32.mrf.mxu0  ;;  %v3335_v48 = vadd.f32 %v6432_v33, %v3175_v45  ;;  %v4260_v52 = vmul.f32 -1.442695, %v6434_v40 }
 0x353   : > { %v3461_v14 = vpop.f32.mrf.mxu1 }
 0x354   : > { %4943 = vtanh.f32 %v3460_v53  ;;  %v3543_v54 = vpop.f32.mrf.mxu0 }
 0x355   : > { %v3462_v55 = vpop.f32.mrf.mxu1 }
 0x356   : > { %v3544_v56 = vpop.f32.mrf.mxu0 }
 0x35f   : > { %v4942_v58 = vpop.eup %4941 }
 0x360   : > { %3686 = vrot.lane.b32.xlu0 %v4942_v58, %s4998_s17 }
 0x361   : > { %v4944_v59 = vpop.eup %4943 }
 0x362   : > { %3688 = vrot.lane.b32.xlu1 %v4944_v59, %s4998_s17 }
 0x38f   : > { %v3498_v51 = vpop.f32.mrf.mxu1 }
 0x390   : > { %v3499_v0 = vadd.f32 %v3498_v51, %v3191_v62  ;;  %v3580_v2 = vpop.f32.mrf.mxu0 }
 0x391   : > { %v3500_v4 = vpop.f32.mrf.mxu1  ;;  %v3581_v34 = vadd.f32 %v3580_v2, %v3199_v30 }
 0x392   : > { %v6448_v6 = vadd.f32 %v3539_v50, %v3499_v0  ;;  %v3501_v7 = vadd.f32 %v3500_v4, %v3195_v63  ;;  %v3582_v8 = vpop.f32.mrf.mxu0  ;;  %v3376_v50 = vadd.f32 %v6358_v5, %v3335_v48 }
 0x393   : > { %v3502_v9 = vpop.f32.mrf.mxu1  ;;  %v3583_v57 = vadd.f32 %v3582_v8, %v3203_v32 }
 0x394   : > { %4945 = vtanh.f32 %v6448_v6  ;;  %v6451_v10 = vadd.f32 %v3541_v3, %v3501_v7  ;;  %v3584_v11 = vpop.f32.mrf.mxu0  ;;  %v4259_v53 = vmul.f32 -1.442695, %v3376_v50  ;;  %v4261_v60 = vmul.f32 -1.442695, %v6448_v6 }
 0x395   : > { %v3503_v12 = vpop.f32.mrf.mxu1  ;;  %4947 = vpow2.f32 %v4257_v16 }
 0x396   : > { %v3585_v13 = vpop.f32.mrf.mxu0  ;;  %4949 = vpow2.f32 %v4258_v20  ;;  %v4262_v61 = vmul.f32 -1.442695, %v6451_v10 }
 0x39e   : > { %v3685_v26 = vpop.permute.xlu0 %3684 }
 0x3a1   : > { %v4946_v15 = vpop.eup %4945 }
 0x3a2   : > { %3690 = vrot.lane.b32.xlu1 %v4946_v15, %s4998_s17  ;;  %v4948_v21 = vpop.eup %4947 }
 0x3a3   : > { %v4950_v28 = vpop.eup %4949  ;;  %v3640_v29 = vadd.f32 1.0, %v4948_v21 }
 0x3a4   : > { %v3641_v31 = vadd.f32 1.0, %v4950_v28  ;;  %v3739_v28 = vunpack.c.l.s4 %v5000_v22 }
 0x3a5   : > { %4951 = vrcp.f32 %v3640_v29 }
 0x3a6   : > { %4953 = vrcp.f32 %v3641_v31  ;;  %v3740_v29 = vunpack.c.0.s8 %v3739_v28 }
 0x3b2   : > { %v4952_v42 = vpop.eup %4951 }
 0x3b3   : > { %v4954_v18 = vpop.eup %4953 }
 0x3c7   : > { %v3621_v35 = vpop.f32.mrf.mxu1 }
 0x3c8   : > { %v6461_v49 = vadd.f32 %v3621_v35, %v3581_v34 }
 0x3c9   : > { %v3623_v36 = vpop.f32.mrf.mxu1 }
 0x3ca   : > { %v6463_v37 = vadd.f32 %v3623_v36, %v3583_v57  ;;  %v4263_v10 = vmul.f32 -1.442695, %v6461_v49  ;;  %v3743_v49 = vsub.s32 %v3740_v29, %v5636_v24 }
 0x3cb   : > { %v3625_v38 = vpop.f32.mrf.mxu1 }
 0x3cc   : > { %v4264_v13 = vmul.f32 -1.442695, %v6463_v37 }
 0x3cd   : > { %v3626_v39 = vpop.f32.mrf.mxu1 }
 0x3d2   : > { %v3687_v41 = vpop.permute.xlu0 %3686 }
 0x3d3   : > { %v3693_v25 = vsel %vm3692_vm2, %v3685_v26, %v3687_v41 }
 0x3d4   : > { %v3700_v19 = vmul.f32 %v4952_v42, %v3693_v25  ;;  %v3689_v27 = vpop.permute.xlu1 %3688 }
 0x3d5   : > { %v3694_v43 = vsel %vm3692_vm2, %v3687_v41, %v3689_v27 }
 0x3d6   : > { %4955 = vtanh.f32 %v3700_v19  ;;  %v3701_v1 = vmul.f32 %v4954_v18, %v3694_v43 }
 0x3d8   : > { %4957 = vtanh.f32 %v3701_v1 }
 0x3d9   : > { %4959 = vpow2.f32 %v4260_v52 }
 0x3da   : > { %4961 = vpow2.f32 %v4259_v53 }
 0x3e3   : > { %v4956_v44 = vpop.eup %4955 }
 0x3e4   : > { %3712 = vrot.lane.b32.xlu0 %v4956_v44, %s4999_s28 }
 0x3e5   : > { %v4958_v46 = vpop.eup %4957 }
 0x3e6   : > { %3714 = vrot.lane.b32.xlu1 %v4958_v46, %s4999_s28  ;;  %v4960_v3 = vpop.eup %4959 }
 0x3e7   : > { %v4962_v14 = vpop.eup %4961  ;;  %v3643_v54 = vadd.f32 1.0, %v4960_v3 }
 0x3e8   : > { %v3642_v55 = vadd.f32 1.0, %v4962_v14 }
 0x3e9   : > { %4963 = vrcp.f32 %v3643_v54 }
 0x3ea   : > { %4965 = vrcp.f32 %v3642_v55 }
 0x3f6   : > { %v4964_v17 = vpop.eup %4963 }
 0x3f7   : > { %v4966_v56 = vpop.eup %4965 }
 0x414   : > { %v3691_v47 = vpop.permute.xlu1 %3690 }
 0x415   : > { %v3695_v58 = vsel %vm3692_vm2, %v3689_v27, %v3691_v47  ;;  %v3703_v59 = vmul.f32 %v4964_v17, %v3691_v47 }
 0x416   : > { %v3702_v33 = vmul.f32 %v4966_v56, %v3695_v58 }
 0x417   : > { %4967 = vtanh.f32 %v3703_v59 }
 0x418   : > { %4969 = vtanh.f32 %v3702_v33 }
 0x419   : > { %4971 = vpow2.f32 %v4261_v60 }
 0x41a   : > { %4973 = vpow2.f32 %v4262_v61 }
 0x424   : > { %v4968_v5 = vpop.eup %4967 }
 0x425   : > { %v4970_v40 = vpop.eup %4969  ;;  %3718 = vrot.lane.b32.xlu1 %v4968_v5, %s4999_s28 }
 0x426   : > { %3716 = vrot.lane.b32.xlu0 %v4970_v40, %s4999_s28  ;;  %v4972_v62 = vpop.eup %4971 }
 0x427   : > { %v4974_v63 = vpop.eup %4973  ;;  %v3668_v51 = vadd.f32 1.0, %v4972_v62 }
 0x428   : > { %v3669_v0 = vadd.f32 1.0, %v4974_v63 }
 0x429   : > { %4975 = vrcp.f32 %v3668_v51 }
 0x42a   : > { %4977 = vrcp.f32 %v3669_v0 }
 0x42b   : > { %4979 = vpow2.f32 %v4263_v10 }
 0x42c   : > { %4981 = vpow2.f32 %v4264_v13 }
 0x436   : > { %v4976_v4 = vpop.eup %4975 }
 0x437   : > { %v4978_v8 = vpop.eup %4977 }
 0x438   : > { %v4980_v15 = vpop.eup %4979 }
 0x439   : > { %v4982_v16 = vpop.eup %4981  ;;  %v3670_v20 = vadd.f32 1.0, %v4980_v15 }
 0x43a   : > { %v3671_v21 = vadd.f32 1.0, %v4982_v16 }
 0x43b   : > { %4983 = vrcp.f32 %v3670_v20 }
 0x43c   : > { %4985 = vrcp.f32 %v3671_v21 }
 0x448   : > { %v4984_v31 = vpop.eup %4983 }
 0x449   : > { %v4986_v34 = vpop.eup %4985 }
 0x456   : > { %v3713_v2 = vpop.permute.xlu0 %3712 }
 0x457   : > { %v3728_v11 = vmul.f32 %v4976_v4, %v3713_v2 }
 0x458   : > { %v3715_v7 = vpop.permute.xlu1 %3714 }
 0x459   : > { %v3721_v9 = vsel %vm3720_vm3, %v3713_v2, %v3715_v7 }
 0x45a   : > { %v3729_v12 = vmul.f32 %v4978_v8, %v3721_v9 }
 0x45c   : > { %v3736_v6 = vcombine.low %v3728_v11, %v3729_v12 }
 0x45e   : > { %v3744_v39 = vrot.slane %v3736_v6, %v3743_v49 }
 0x497   : > { %v3719_v30 = vpop.permute.xlu1 %3718 }
 0x498   : > { %v3717_v32 = vpop.permute.xlu0 %3716 }
 0x499   : > { %v3722_v35 = vsel %vm3720_vm3, %v3715_v7, %v3717_v32  ;;  %v3723_v57 = vsel %vm3720_vm3, %v3717_v32, %v3719_v30 }
 0x49a   : > { %v3730_v36 = vmul.f32 %v4984_v31, %v3722_v35  ;;  %v3731_v37 = vmul.f32 %v4986_v34, %v3723_v57 }
 0x49c   : > { %v3737_v38 = vcombine.low %v3730_v36, %v3731_v37 }
 0x49e   : > { %v3751_v26 = vrot.slane %v3737_v38, %v3743_v49 }
 0x4a0   : > { %v3752_v41 = vcombine.low %v3744_v39, %v3751_v26 }
 0x4a2   : > { %v3759_v42 = vrot.slane %v3752_v41, %v3743_v49 }
 0x4a4   : > { %3760 = vrot.lane.b32.xlu0 %v3759_v42, %s5001_s29 }
 0x516   : > { %v3761_v25 = vpop.permute.xlu0 %3760 }
 0x517   : > { %v3762_v19 = vrot.slane %v3761_v25, 1 }
 0x519   : > { %v3763_v24 = vsel %vm3214_vm1, %v3761_v25, %v3762_v19 }
 0x51a   : > { %3769 = vst.msk [vmem:[%s276_s10] sm:$0xf] %vm3767_vm4, %v3763_v24 }
 0x51b PF: > { %s17_s24 = sadd.s32 1, %s4993_s24  }
 0x51c   : > { %p14_p4 = scmp.ge.s32.totalorder %s17_s24, 4  }
 0x51e   :  { %16 = sbr.rel (!%p14_p4) target bundleno = 1 (0x1), region = 78 }

</bundles_post_ra>
